<compile_context>
chip_gen: v5e
topology: v5e:2x2
jax: 0.10.0
libtpu: 0.0.40
codegen_flags: <defaults>
</compile_context>

<pallas_src>
import functools

import numpy as np
import jax
import jax.numpy as jnp
from jax import lax
from jax.experimental import pallas as pl
from jax.experimental.pallas import tpu as pltpu

_SQRT_2_OVER_PI = 0.7978845608028654
_BN_EPS = 1e-5


def _gelu_tanh(x):
    # TODO(synk): nn.GELU() default is the exact erf formulation; the tanh
    # approximation is used here for Mosaic-safe lowering (max |diff| ~1e-3).
    return 0.5 * x * (1.0 + jnp.tanh(_SQRT_2_OVER_PI * (x + 0.044715 * x * x * x)))


def _elu(x):
    # nn.ELU(alpha=1): x if x > 0 else exp(x) - 1
    return jnp.where(x > 0, x, jnp.exp(jnp.minimum(x, 0.0)) - 1.0)


def _roll_lanes(x, shift):
    """Static roll along the last (lane) axis: out[.., p] = x[.., (p - shift) % n]."""
    n = x.shape[-1]
    shift = shift % n
    if shift == 0:
        return x
    return jnp.concatenate([x[:, n - shift:], x[:, :n - shift]], axis=-1)


def _convffn_kernel(x_ref, wl_ref, bbk_ref, w1t_ref, b1_ref, w2t_ref, b2_ref,
                    o_ref, bcol_ref, *, width):
    x = x_ref[...]                              # (C, H*W) fp32, one image per grid step
    C, HW = x.shape
    K, Cout, _ = wl_ref.shape
    W = width
    H = HW // W
    Ho, Wo = H - K + 1, W - K + 1
    ph, pw = (H - Ho) // 2, (W - Wo) // 2

    # ---- right branch: BN2r folded into conv1; spatial stays on the lane axis ----
    h = jnp.dot(w1t_ref[...], x, preferred_element_type=jnp.float32) + b1_ref[...]
    h = _gelu_tanh(h)                                              # (Chid, HW)
    r = jnp.dot(w2t_ref[...], h, preferred_element_type=jnp.float32) + b2_ref[...]

    # ---- left branch: BN1l folded into the KxK conv weights ----
    # Stage the kw-shifted copies of x in a VMEM scratch:
    #   bcol[kw*C + c, p] = x[c, p + kw - pw]
    # (lane wrap-around only touches positions outside the valid interior -> masked)
    for kw in range(K):
        bcol_ref[kw * C:(kw + 1) * C, :] = _roll_lanes(x, pw - kw)
    bcol = bcol_ref[...]                                           # (K*C, HW)

    # K matmuls with contraction depth K*C; the kh (row) shift is a lane rotation
    # of the (Cout, HW) result by a multiple of W.
    acc = jnp.zeros((Cout, HW), jnp.float32)
    for kh in range(K):
        m = jnp.dot(wl_ref[kh], bcol, preferred_element_type=jnp.float32)
        acc = acc + _roll_lanes(m, (ph - kh) * W)
    lout = _elu(acc + bbk_ref[...])                                # (Cout, HW)

    # reparameter(): zero-pad the valid-conv result to (H, W) == keep only the
    # interior lanes, add the shortcut, and store the full block exactly once.
    lane = lax.broadcasted_iota(jnp.int32, (Cout, HW), 1)
    inside = None
    for oh in range(Ho):
        base = (ph + oh) * W + pw
        mrow = (lane >= base) & (lane < base + Wo)
        inside = mrow if inside is None else (inside | mrow)

    o_ref[...] = (r + jnp.where(inside, lout, 0.0)).astype(o_ref.dtype)


def convffn_forward(x_nchw, params):
    """Pallas forward. x_nchw: (N, Cin, H, W) fp32 -> (N, Cout, H, W) fp32."""
    x = x_nchw.astype(jnp.float32)
    N, C, H, W = x.shape
    K = params["w_bk"].shape[0]
    Cout = params["w_bk"].shape[3]
    Chid = params["w1"].shape[1]
    HW = H * W

    # Training-mode BatchNorm (batch statistics, biased variance), folded to a
    # per-channel affine and then folded into the conv weights/biases.
    mean = jnp.mean(x, axis=(0, 2, 3))
    var = jnp.mean(jnp.square(x - mean[None, :, None, None]), axis=(0, 2, 3))
    inv = lax.rsqrt(var + _BN_EPS)
    s1 = params["gamma1"] * inv
    t1 = params["beta1"] - s1 * mean
    s2 = params["gamma2"] * inv
    t2 = params["beta2"] - s2 * mean

    # Left branch: BN1l folded into the KxK conv.
    wl = params["w_bk"] * s1[None, None, :, None]                    # (K, K, C, Cout)
    wl_t = jnp.transpose(wl.reshape(K, K * C, Cout), (0, 2, 1))      # (K, Cout, K*C)
    bbk = params["b_bk"] + jnp.einsum("hwco,c->o", params["w_bk"], t1)

    # Right branch: BN2r folded into conv1; weights transposed to weight-stationary form.
    w1t = (params["w1"] * s2[:, None]).T                             # (Chid, C)
    b1f = params["b1"] + t2 @ params["w1"]                           # (Chid,)
    w2t = params["w2"].T                                             # (Cout, Chid)

    x_flat = x.reshape(N, C, HW)       # NCHW with spatial flattened onto lanes

    kernel = functools.partial(_convffn_kernel, width=W)
    out_flat = pl.pallas_call(
        kernel,
        out_shape=jax.ShapeDtypeStruct((N, Cout, HW), jnp.float32),
        grid_spec=pltpu.PrefetchScalarGridSpec(
            num_scalar_prefetch=0,
            grid=(N,),
            in_specs=[
                pl.BlockSpec((None, C, HW), lambda n: (n, 0, 0)),        # x
                pl.BlockSpec((K, Cout, K * C), lambda n: (0, 0, 0)),     # KxK weights
                pl.BlockSpec((Cout, 1), lambda n: (0, 0)),               # KxK bias
                pl.BlockSpec((Chid, C), lambda n: (0, 0)),               # conv1 (1x1)
                pl.BlockSpec((Chid, 1), lambda n: (0, 0)),               # conv1 bias
                pl.BlockSpec((Cout, Chid), lambda n: (0, 0)),            # conv2 (1x1)
                pl.BlockSpec((Cout, 1), lambda n: (0, 0)),               # conv2 bias
            ],
            out_specs=pl.BlockSpec((None, Cout, HW), lambda n: (n, 0, 0)),
            scratch_shapes=[pltpu.VMEM((K * C, HW), jnp.float32)],
        ),
        compiler_params=pltpu.CompilerParams(dimension_semantics=("parallel",)),
    )(x_flat, wl_t, bbk.reshape(Cout, 1), w1t, b1f.reshape(Chid, 1),
      w2t, params["b2"].reshape(Cout, 1))

    return out_flat.reshape(N, Cout, H, W)


def convffn_reference(x_nchw, params):
    """Pure-JAX reference of the PyTorch forward (training-mode BN)."""
    x = jnp.transpose(x_nchw, (0, 2, 3, 1)).astype(jnp.float32)
    mean = jnp.mean(x, axis=(0, 1, 2))
    var = jnp.mean(jnp.square(x - mean), axis=(0, 1, 2))
    inv = lax.rsqrt(var + _BN_EPS)
    xl = (x - mean) * inv * params["gamma1"] + params["beta1"]
    xr = (x - mean) * inv * params["gamma2"] + params["beta2"]

    lout = lax.conv_general_dilated(
        xl, params["w_bk"], window_strides=(1, 1), padding="VALID",
        dimension_numbers=("NHWC", "HWIO", "NHWC")) + params["b_bk"]
    lout = _elu(lout)

    h = jnp.einsum("nhwc,cd->nhwd", xr, params["w1"]) + params["b1"]
    h = _gelu_tanh(h)
    rout = jnp.einsum("nhwd,do->nhwo", h, params["w2"]) + params["b2"]

    ph = (x.shape[1] - lout.shape[1]) // 2
    pw = (x.shape[2] - lout.shape[2]) // 2
    lpad = jnp.pad(lout, ((0, 0), (ph, ph), (pw, pw), (0, 0)))
    return jnp.transpose(lpad + rout, (0, 3, 1, 2))


def init_params(key, in_channels, out_channels, kernel_size):
    ks = jax.random.split(key, 10)
    c, co, k, ch = in_channels, out_channels, kernel_size, 4 * in_channels
    return {
        "gamma1": 1.0 + 0.1 * jax.random.normal(ks[0], (c,), jnp.float32),
        "beta1": 0.1 * jax.random.normal(ks[1], (c,), jnp.float32),
        "gamma2": 1.0 + 0.1 * jax.random.normal(ks[2], (c,), jnp.float32),
        "beta2": 0.1 * jax.random.normal(ks[3], (c,), jnp.float32),
        "w_bk": 0.05 * jax.random.normal(ks[4], (k, k, c, co), jnp.float32),
        "b_bk": 0.05 * jax.random.normal(ks[5], (co,), jnp.float32),
        "w1": 0.2 * jax.random.normal(ks[6], (c, ch), jnp.float32),
        "b1": 0.1 * jax.random.normal(ks[7], (ch,), jnp.float32),
        "w2": 0.2 * jax.random.normal(ks[8], (ch, co), jnp.float32),
        "b2": 0.1 * jax.random.normal(ks[9], (co,), jnp.float32),
    }


if __name__ == "__main__":
    key = jax.random.PRNGKey(0)
    pkey, xkey = jax.random.split(key)
    N, C, COUT, H, W, K = 2, 4, 4, 16, 16, 13

    params = init_params(pkey, C, COUT, K)
    x = jax.random.normal(xkey, (N, C, H, W), jnp.float32)

    out = jax.block_until_ready(convffn_forward(x, params))
    ref = jax.block_until_ready(convffn_reference(x, params))

    assert out.shape == (N, COUT, H, W), out.shape
    np.testing.assert_allclose(np.asarray(out), np.asarray(ref),
                               rtol=1e-2, atol=1e-2)
    print("KERNEL_OK")
</pallas_src>

<mosaic_0001>
module attributes {stable_mosaic.version = 11 : i64} {
  func.func @_convffn_kernel(%arg0: i32, %arg1: memref<1x4x256xf32, #tpu.memory_space<vmem>>, %arg2: memref<13x4x52xf32, #tpu.memory_space<vmem>>, %arg3: memref<4x1xf32, #tpu.memory_space<vmem>>, %arg4: memref<16x4xf32, #tpu.memory_space<vmem>>, %arg5: memref<16x1xf32, #tpu.memory_space<vmem>>, %arg6: memref<4x16xf32, #tpu.memory_space<vmem>>, %arg7: memref<4x1xf32, #tpu.memory_space<vmem>>, %arg8: memref<1x4x256xf32, #tpu.memory_space<vmem>>, %arg9: memref<52x256xf32, #tpu.memory_space<vmem>>) attributes {dimension_semantics = [#tpu.dimension_semantics<parallel>], iteration_bounds = array<i64: 2>, scalar_prefetch = 0 : i64, scratch_operands = 1 : i64, tpu.core_type = #tpu.core_type<tc>, window_params = [{transform_indices = @transform_0, window_bounds = array<i64: 1, 4, 256>}, {pipeline_mode = #tpu.pipeline_mode<synchronous>, transform_indices = @transform_1, window_bounds = array<i64: 13, 4, 52>}, {pipeline_mode = #tpu.pipeline_mode<synchronous>, transform_indices = @transform_2, window_bounds = array<i64: 4, 1>}, {pipeline_mode = #tpu.pipeline_mode<synchronous>, transform_indices = @transform_3, window_bounds = array<i64: 16, 4>}, {pipeline_mode = #tpu.pipeline_mode<synchronous>, transform_indices = @transform_4, window_bounds = array<i64: 16, 1>}, {pipeline_mode = #tpu.pipeline_mode<synchronous>, transform_indices = @transform_5, window_bounds = array<i64: 4, 16>}, {pipeline_mode = #tpu.pipeline_mode<synchronous>, transform_indices = @transform_6, window_bounds = array<i64: 4, 1>}, {transform_indices = @transform_7, window_bounds = array<i64: 1, 4, 256>}]} {
    %c0 = arith.constant 0 : index
    %c0_0 = arith.constant 0 : index
    %c0_1 = arith.constant 0 : index
    %0 = vector.load %arg1[%c0, %c0_0, %c0_1] : memref<1x4x256xf32, #tpu.memory_space<vmem>>, vector<1x4x256xf32>
    %1 = vector.shape_cast %0 : vector<1x4x256xf32> to vector<4x256xf32>
    %c0_2 = arith.constant 0 : index
    %c0_3 = arith.constant 0 : index
    %2 = vector.load %arg4[%c0_2, %c0_3] : memref<16x4xf32, #tpu.memory_space<vmem>>, vector<16x4xf32>
    %cst = arith.constant dense<0.000000e+00> : vector<16x256xf32>
    %3 = tpu.matmul %2, %1, %cst {dimension_numbers = #tpu.dot_dimension_numbers<[1], [0], [0], [1], [0, 0, 1, 1], [], []>} : vector<16x4xf32>, vector<4x256xf32>, vector<16x256xf32> -> vector<16x256xf32>
    %c0_4 = arith.constant 0 : index
    %c0_5 = arith.constant 0 : index
    %4 = vector.load %arg5[%c0_4, %c0_5] : memref<16x1xf32, #tpu.memory_space<vmem>>, vector<16x1xf32>
    %5 = vector.broadcast %4 : vector<16x1xf32> to vector<16x256xf32>
    %6 = arith.addf %3, %5 : vector<16x256xf32>
    %cst_6 = arith.constant 5.000000e-01 : f32
    %7 = vector.broadcast %cst_6 : f32 to vector<16x256xf32>
    %8 = arith.mulf %7, %6 : vector<16x256xf32>
    %cst_7 = arith.constant 4.471500e-02 : f32
    %9 = vector.broadcast %cst_7 : f32 to vector<16x256xf32>
    %10 = arith.mulf %9, %6 : vector<16x256xf32>
    %11 = arith.mulf %10, %6 : vector<16x256xf32>
    %12 = arith.mulf %11, %6 : vector<16x256xf32>
    %13 = arith.addf %6, %12 : vector<16x256xf32>
    %cst_8 = arith.constant 0.797884583 : f32
    %14 = vector.broadcast %cst_8 : f32 to vector<16x256xf32>
    %15 = arith.mulf %14, %13 : vector<16x256xf32>
    %16 = math.tanh %15 : vector<16x256xf32>
    %cst_9 = arith.constant 1.000000e+00 : f32
    %17 = vector.broadcast %cst_9 : f32 to vector<16x256xf32>
    %18 = arith.addf %17, %16 : vector<16x256xf32>
    %19 = arith.mulf %8, %18 : vector<16x256xf32>
    %c0_10 = arith.constant 0 : index
    %c0_11 = arith.constant 0 : index
    %20 = vector.load %arg6[%c0_10, %c0_11] : memref<4x16xf32, #tpu.memory_space<vmem>>, vector<4x16xf32>
    %cst_12 = arith.constant dense<0.000000e+00> : vector<4x256xf32>
    %21 = tpu.matmul %20, %19, %cst_12 {dimension_numbers = #tpu.dot_dimension_numbers<[1], [0], [0], [1], [0, 0, 1, 1], [], []>} : vector<4x16xf32>, vector<16x256xf32>, vector<4x256xf32> -> vector<4x256xf32>
    %c0_13 = arith.constant 0 : index
    %c0_14 = arith.constant 0 : index
    %22 = vector.load %arg7[%c0_13, %c0_14] : memref<4x1xf32, #tpu.memory_space<vmem>>, vector<4x1xf32>
    %23 = vector.broadcast %22 : vector<4x1xf32> to vector<4x256xf32>
    %24 = arith.addf %21, %23 : vector<4x256xf32>
    %25 = vector.extract_strided_slice %1 {offsets = [0, 250], sizes = [4, 6], strides = [1, 1]} : vector<4x256xf32> to vector<4x6xf32>
    %26 = vector.extract_strided_slice %1 {offsets = [0, 0], sizes = [4, 250], strides = [1, 1]} : vector<4x256xf32> to vector<4x250xf32>
    %27 = tpu.concatenate %25, %26 in 1 : vector<4x6xf32>, vector<4x250xf32> -> vector<4x256xf32>
    %c0_15 = arith.constant 0 : index
    %c0_16 = arith.constant 0 : index
    %28 = vector.load %arg9[%c0_15, %c0_16] : memref<52x256xf32, #tpu.memory_space<vmem>>, vector<4x256xf32>
    tpu.vector_store %arg9[%c0_15, %c0_16], %27 {strides = array<i32>} : memref<52x256xf32, #tpu.memory_space<vmem>>, vector<4x256xf32>,
    %29 = vector.extract_strided_slice %1 {offsets = [0, 251], sizes = [4, 5], strides = [1, 1]} : vector<4x256xf32> to vector<4x5xf32>
    %30 = vector.extract_strided_slice %1 {offsets = [0, 0], sizes = [4, 251], strides = [1, 1]} : vector<4x256xf32> to vector<4x251xf32>
    %31 = tpu.concatenate %29, %30 in 1 : vector<4x5xf32>, vector<4x251xf32> -> vector<4x256xf32>
    %c4 = arith.constant 4 : index
    %c0_17 = arith.constant 0 : index
    %32 = vector.load %arg9[%c4, %c0_17] : memref<52x256xf32, #tpu.memory_space<vmem>>, vector<4x256xf32>
    tpu.vector_store %arg9[%c4, %c0_17], %31 {strides = array<i32>} : memref<52x256xf32, #tpu.memory_space<vmem>>, vector<4x256xf32>,
    %33 = vector.extract_strided_slice %1 {offsets = [0, 252], sizes = [4, 4], strides = [1, 1]} : vector<4x256xf32> to vector<4x4xf32>
    %34 = vector.extract_strided_slice %1 {offsets = [0, 0], sizes = [4, 252], strides = [1, 1]} : vector<4x256xf32> to vector<4x252xf32>
    %35 = tpu.concatenate %33, %34 in 1 : vector<4x4xf32>, vector<4x252xf32> -> vector<4x256xf32>
    %c8 = arith.constant 8 : index
    %c0_18 = arith.constant 0 : index
    %36 = vector.load %arg9[%c8, %c0_18] : memref<52x256xf32, #tpu.memory_space<vmem>>, vector<4x256xf32>
    tpu.vector_store %arg9[%c8, %c0_18], %35 {strides = array<i32>} : memref<52x256xf32, #tpu.memory_space<vmem>>, vector<4x256xf32>,
    %37 = vector.extract_strided_slice %1 {offsets = [0, 253], sizes = [4, 3], strides = [1, 1]} : vector<4x256xf32> to vector<4x3xf32>
    %38 = vector.extract_strided_slice %1 {offsets = [0, 0], sizes = [4, 253], strides = [1, 1]} : vector<4x256xf32> to vector<4x253xf32>
    %39 = tpu.concatenate %37, %38 in 1 : vector<4x3xf32>, vector<4x253xf32> -> vector<4x256xf32>
    %c12 = arith.constant 12 : index
    %c0_19 = arith.constant 0 : index
    %40 = vector.load %arg9[%c12, %c0_19] : memref<52x256xf32, #tpu.memory_space<vmem>>, vector<4x256xf32>
    tpu.vector_store %arg9[%c12, %c0_19], %39 {strides = array<i32>} : memref<52x256xf32, #tpu.memory_space<vmem>>, vector<4x256xf32>,
    %41 = vector.extract_strided_slice %1 {offsets = [0, 254], sizes = [4, 2], strides = [1, 1]} : vector<4x256xf32> to vector<4x2xf32>
    %42 = vector.extract_strided_slice %1 {offsets = [0, 0], sizes = [4, 254], strides = [1, 1]} : vector<4x256xf32> to vector<4x254xf32>
    %43 = tpu.concatenate %41, %42 in 1 : vector<4x2xf32>, vector<4x254xf32> -> vector<4x256xf32>
    %c16 = arith.constant 16 : index
    %c0_20 = arith.constant 0 : index
    %44 = vector.load %arg9[%c16, %c0_20] : memref<52x256xf32, #tpu.memory_space<vmem>>, vector<4x256xf32>
    tpu.vector_store %arg9[%c16, %c0_20], %43 {strides = array<i32>} : memref<52x256xf32, #tpu.memory_space<vmem>>, vector<4x256xf32>,
    %45 = vector.extract_strided_slice %1 {offsets = [0, 255], sizes = [4, 1], strides = [1, 1]} : vector<4x256xf32> to vector<4x1xf32>
    %46 = vector.extract_strided_slice %1 {offsets = [0, 0], sizes = [4, 255], strides = [1, 1]} : vector<4x256xf32> to vector<4x255xf32>
    %47 = tpu.concatenate %45, %46 in 1 : vector<4x1xf32>, vector<4x255xf32> -> vector<4x256xf32>
    %c20 = arith.constant 20 : index
    %c0_21 = arith.constant 0 : index
    %48 = vector.load %arg9[%c20, %c0_21] : memref<52x256xf32, #tpu.memory_space<vmem>>, vector<4x256xf32>
    tpu.vector_store %arg9[%c20, %c0_21], %47 {strides = array<i32>} : memref<52x256xf32, #tpu.memory_space<vmem>>, vector<4x256xf32>,
    %c24 = arith.constant 24 : index
    %c0_22 = arith.constant 0 : index
    %49 = vector.load %arg9[%c24, %c0_22] : memref<52x256xf32, #tpu.memory_space<vmem>>, vector<4x256xf32>
    tpu.vector_store %arg9[%c24, %c0_22], %1 {strides = array<i32>} : memref<52x256xf32, #tpu.memory_space<vmem>>, vector<4x256xf32>,
    %50 = vector.extract_strided_slice %1 {offsets = [0, 1], sizes = [4, 255], strides = [1, 1]} : vector<4x256xf32> to vector<4x255xf32>
    %51 = vector.extract_strided_slice %1 {offsets = [0, 0], sizes = [4, 1], strides = [1, 1]} : vector<4x256xf32> to vector<4x1xf32>
    %52 = tpu.concatenate %50, %51 in 1 : vector<4x255xf32>, vector<4x1xf32> -> vector<4x256xf32>
    %c28 = arith.constant 28 : index
    %c0_23 = arith.constant 0 : index
    %53 = vector.load %arg9[%c28, %c0_23] : memref<52x256xf32, #tpu.memory_space<vmem>>, vector<4x256xf32>
    tpu.vector_store %arg9[%c28, %c0_23], %52 {strides = array<i32>} : memref<52x256xf32, #tpu.memory_space<vmem>>, vector<4x256xf32>,
    %54 = vector.extract_strided_slice %1 {offsets = [0, 2], sizes = [4, 254], strides = [1, 1]} : vector<4x256xf32> to vector<4x254xf32>
    %55 = vector.extract_strided_slice %1 {offsets = [0, 0], sizes = [4, 2], strides = [1, 1]} : vector<4x256xf32> to vector<4x2xf32>
    %56 = tpu.concatenate %54, %55 in 1 : vector<4x254xf32>, vector<4x2xf32> -> vector<4x256xf32>
    %c32 = arith.constant 32 : index
    %c0_24 = arith.constant 0 : index
    %57 = vector.load %arg9[%c32, %c0_24] : memref<52x256xf32, #tpu.memory_space<vmem>>, vector<4x256xf32>
    tpu.vector_store %arg9[%c32, %c0_24], %56 {strides = array<i32>} : memref<52x256xf32, #tpu.memory_space<vmem>>, vector<4x256xf32>,
    %58 = vector.extract_strided_slice %1 {offsets = [0, 3], sizes = [4, 253], strides = [1, 1]} : vector<4x256xf32> to vector<4x253xf32>
    %59 = vector.extract_strided_slice %1 {offsets = [0, 0], sizes = [4, 3], strides = [1, 1]} : vector<4x256xf32> to vector<4x3xf32>
    %60 = tpu.concatenate %58, %59 in 1 : vector<4x253xf32>, vector<4x3xf32> -> vector<4x256xf32>
    %c36 = arith.constant 36 : index
    %c0_25 = arith.constant 0 : index
    %61 = vector.load %arg9[%c36, %c0_25] : memref<52x256xf32, #tpu.memory_space<vmem>>, vector<4x256xf32>
    tpu.vector_store %arg9[%c36, %c0_25], %60 {strides = array<i32>} : memref<52x256xf32, #tpu.memory_space<vmem>>, vector<4x256xf32>,
    %62 = vector.extract_strided_slice %1 {offsets = [0, 4], sizes = [4, 252], strides = [1, 1]} : vector<4x256xf32> to vector<4x252xf32>
    %63 = vector.extract_strided_slice %1 {offsets = [0, 0], sizes = [4, 4], strides = [1, 1]} : vector<4x256xf32> to vector<4x4xf32>
    %64 = tpu.concatenate %62, %63 in 1 : vector<4x252xf32>, vector<4x4xf32> -> vector<4x256xf32>
    %c40 = arith.constant 40 : index
    %c0_26 = arith.constant 0 : index
    %65 = vector.load %arg9[%c40, %c0_26] : memref<52x256xf32, #tpu.memory_space<vmem>>, vector<4x256xf32>
    tpu.vector_store %arg9[%c40, %c0_26], %64 {strides = array<i32>} : memref<52x256xf32, #tpu.memory_space<vmem>>, vector<4x256xf32>,
    %66 = vector.extract_strided_slice %1 {offsets = [0, 5], sizes = [4, 251], strides = [1, 1]} : vector<4x256xf32> to vector<4x251xf32>
    %67 = vector.extract_strided_slice %1 {offsets = [0, 0], sizes = [4, 5], strides = [1, 1]} : vector<4x256xf32> to vector<4x5xf32>
    %68 = tpu.concatenate %66, %67 in 1 : vector<4x251xf32>, vector<4x5xf32> -> vector<4x256xf32>
    %c44 = arith.constant 44 : index
    %c0_27 = arith.constant 0 : index
    %69 = vector.load %arg9[%c44, %c0_27] : memref<52x256xf32, #tpu.memory_space<vmem>>, vector<4x256xf32>
    tpu.vector_store %arg9[%c44, %c0_27], %68 {strides = array<i32>} : memref<52x256xf32, #tpu.memory_space<vmem>>, vector<4x256xf32>,
    %70 = vector.extract_strided_slice %1 {offsets = [0, 6], sizes = [4, 250], strides = [1, 1]} : vector<4x256xf32> to vector<4x250xf32>
    %71 = vector.extract_strided_slice %1 {offsets = [0, 0], sizes = [4, 6], strides = [1, 1]} : vector<4x256xf32> to vector<4x6xf32>
    %72 = tpu.concatenate %70, %71 in 1 : vector<4x250xf32>, vector<4x6xf32> -> vector<4x256xf32>
    %c48 = arith.constant 48 : index
    %c0_28 = arith.constant 0 : index
    %73 = vector.load %arg9[%c48, %c0_28] : memref<52x256xf32, #tpu.memory_space<vmem>>, vector<4x256xf32>
    tpu.vector_store %arg9[%c48, %c0_28], %72 {strides = array<i32>} : memref<52x256xf32, #tpu.memory_space<vmem>>, vector<4x256xf32>,
    %c0_29 = arith.constant 0 : index
    %c0_30 = arith.constant 0 : index
    %74 = vector.load %arg9[%c0_29, %c0_30] : memref<52x256xf32, #tpu.memory_space<vmem>>, vector<52x256xf32>
    %cst_31 = arith.constant 0.000000e+00 : f32
    %75 = vector.broadcast %cst_31 : f32 to vector<4x256xf32>
    %c0_32 = arith.constant 0 : index
    %c0_33 = arith.constant 0 : index
    %c0_34 = arith.constant 0 : index
    %76 = vector.load %arg2[%c0_32, %c0_33, %c0_34] : memref<13x4x52xf32, #tpu.memory_space<vmem>>, vector<1x4x52xf32>
    %77 = vector.shape_cast %76 : vector<1x4x52xf32> to vector<4x52xf32>
    %cst_35 = arith.constant dense<0.000000e+00> : vector<4x256xf32>
    %78 = tpu.matmul %77, %74, %cst_35 {dimension_numbers = #tpu.dot_dimension_numbers<[1], [0], [0], [1], [0, 0, 1, 1], [], []>} : vector<4x52xf32>, vector<52x256xf32>, vector<4x256xf32> -> vector<4x256xf32>
    %79 = vector.extract_strided_slice %78 {offsets = [0, 160], sizes = [4, 96], strides = [1, 1]} : vector<4x256xf32> to vector<4x96xf32>
    %80 = vector.extract_strided_slice %78 {offsets = [0, 0], sizes = [4, 160], strides = [1, 1]} : vector<4x256xf32> to vector<4x160xf32>
    %81 = tpu.concatenate %79, %80 in 1 : vector<4x96xf32>, vector<4x160xf32> -> vector<4x256xf32>
    %82 = arith.addf %75, %81 : vector<4x256xf32>
    %c1 = arith.constant 1 : index
    %c0_36 = arith.constant 0 : index
    %c0_37 = arith.constant 0 : index
    %83 = vector.load %arg2[%c1, %c0_36, %c0_37] : memref<13x4x52xf32, #tpu.memory_space<vmem>>, vector<1x4x52xf32>
    %84 = vector.shape_cast %83 : vector<1x4x52xf32> to vector<4x52xf32>
    %cst_38 = arith.constant dense<0.000000e+00> : vector<4x256xf32>
    %85 = tpu.matmul %84, %74, %cst_38 {dimension_numbers = #tpu.dot_dimension_numbers<[1], [0], [0], [1], [0, 0, 1, 1], [], []>} : vector<4x52xf32>, vector<52x256xf32>, vector<4x256xf32> -> vector<4x256xf32>
    %86 = vector.extract_strided_slice %85 {offsets = [0, 176], sizes = [4, 80], strides = [1, 1]} : vector<4x256xf32> to vector<4x80xf32>
    %87 = vector.extract_strided_slice %85 {offsets = [0, 0], sizes = [4, 176], strides = [1, 1]} : vector<4x256xf32> to vector<4x176xf32>
    %88 = tpu.concatenate %86, %87 in 1 : vector<4x80xf32>, vector<4x176xf32> -> vector<4x256xf32>
    %89 = arith.addf %82, %88 : vector<4x256xf32>
    %c2 = arith.constant 2 : index
    %c0_39 = arith.constant 0 : index
    %c0_40 = arith.constant 0 : index
    %90 = vector.load %arg2[%c2, %c0_39, %c0_40] : memref<13x4x52xf32, #tpu.memory_space<vmem>>, vector<1x4x52xf32>
    %91 = vector.shape_cast %90 : vector<1x4x52xf32> to vector<4x52xf32>
    %cst_41 = arith.constant dense<0.000000e+00> : vector<4x256xf32>
    %92 = tpu.matmul %91, %74, %cst_41 {dimension_numbers = #tpu.dot_dimension_numbers<[1], [0], [0], [1], [0, 0, 1, 1], [], []>} : vector<4x52xf32>, vector<52x256xf32>, vector<4x256xf32> -> vector<4x256xf32>
    %93 = vector.extract_strided_slice %92 {offsets = [0, 192], sizes = [4, 64], strides = [1, 1]} : vector<4x256xf32> to vector<4x64xf32>
    %94 = vector.extract_strided_slice %92 {offsets = [0, 0], sizes = [4, 192], strides = [1, 1]} : vector<4x256xf32> to vector<4x192xf32>
    %95 = tpu.concatenate %93, %94 in 1 : vector<4x64xf32>, vector<4x192xf32> -> vector<4x256xf32>
    %96 = arith.addf %89, %95 : vector<4x256xf32>
    %c3 = arith.constant 3 : index
    %c0_42 = arith.constant 0 : index
    %c0_43 = arith.constant 0 : index
    %97 = vector.load %arg2[%c3, %c0_42, %c0_43] : memref<13x4x52xf32, #tpu.memory_space<vmem>>, vector<1x4x52xf32>
    %98 = vector.shape_cast %97 : vector<1x4x52xf32> to vector<4x52xf32>
    %cst_44 = arith.constant dense<0.000000e+00> : vector<4x256xf32>
    %99 = tpu.matmul %98, %74, %cst_44 {dimension_numbers = #tpu.dot_dimension_numbers<[1], [0], [0], [1], [0, 0, 1, 1], [], []>} : vector<4x52xf32>, vector<52x256xf32>, vector<4x256xf32> -> vector<4x256xf32>
    %100 = vector.extract_strided_slice %99 {offsets = [0, 208], sizes = [4, 48], strides = [1, 1]} : vector<4x256xf32> to vector<4x48xf32>
    %101 = vector.extract_strided_slice %99 {offsets = [0, 0], sizes = [4, 208], strides = [1, 1]} : vector<4x256xf32> to vector<4x208xf32>
    %102 = tpu.concatenate %100, %101 in 1 : vector<4x48xf32>, vector<4x208xf32> -> vector<4x256xf32>
    %103 = arith.addf %96, %102 : vector<4x256xf32>
    %c4_45 = arith.constant 4 : index
    %c0_46 = arith.constant 0 : index
    %c0_47 = arith.constant 0 : index
    %104 = vector.load %arg2[%c4_45, %c0_46, %c0_47] : memref<13x4x52xf32, #tpu.memory_space<vmem>>, vector<1x4x52xf32>
    %105 = vector.shape_cast %104 : vector<1x4x52xf32> to vector<4x52xf32>
    %cst_48 = arith.constant dense<0.000000e+00> : vector<4x256xf32>
    %106 = tpu.matmul %105, %74, %cst_48 {dimension_numbers = #tpu.dot_dimension_numbers<[1], [0], [0], [1], [0, 0, 1, 1], [], []>} : vector<4x52xf32>, vector<52x256xf32>, vector<4x256xf32> -> vector<4x256xf32>
    %107 = vector.extract_strided_slice %106 {offsets = [0, 224], sizes = [4, 32], strides = [1, 1]} : vector<4x256xf32> to vector<4x32xf32>
    %108 = vector.extract_strided_slice %106 {offsets = [0, 0], sizes = [4, 224], strides = [1, 1]} : vector<4x256xf32> to vector<4x224xf32>
    %109 = tpu.concatenate %107, %108 in 1 : vector<4x32xf32>, vector<4x224xf32> -> vector<4x256xf32>
    %110 = arith.addf %103, %109 : vector<4x256xf32>
    %c5 = arith.constant 5 : index
    %c0_49 = arith.constant 0 : index
    %c0_50 = arith.constant 0 : index
    %111 = vector.load %arg2[%c5, %c0_49, %c0_50] : memref<13x4x52xf32, #tpu.memory_space<vmem>>, vector<1x4x52xf32>
    %112 = vector.shape_cast %111 : vector<1x4x52xf32> to vector<4x52xf32>
    %cst_51 = arith.constant dense<0.000000e+00> : vector<4x256xf32>
    %113 = tpu.matmul %112, %74, %cst_51 {dimension_numbers = #tpu.dot_dimension_numbers<[1], [0], [0], [1], [0, 0, 1, 1], [], []>} : vector<4x52xf32>, vector<52x256xf32>, vector<4x256xf32> -> vector<4x256xf32>
    %114 = vector.extract_strided_slice %113 {offsets = [0, 240], sizes = [4, 16], strides = [1, 1]} : vector<4x256xf32> to vector<4x16xf32>
    %115 = vector.extract_strided_slice %113 {offsets = [0, 0], sizes = [4, 240], strides = [1, 1]} : vector<4x256xf32> to vector<4x240xf32>
    %116 = tpu.concatenate %114, %115 in 1 : vector<4x16xf32>, vector<4x240xf32> -> vector<4x256xf32>
    %117 = arith.addf %110, %116 : vector<4x256xf32>
    %c6 = arith.constant 6 : index
    %c0_52 = arith.constant 0 : index
    %c0_53 = arith.constant 0 : index
    %118 = vector.load %arg2[%c6, %c0_52, %c0_53] : memref<13x4x52xf32, #tpu.memory_space<vmem>>, vector<1x4x52xf32>
    %119 = vector.shape_cast %118 : vector<1x4x52xf32> to vector<4x52xf32>
    %cst_54 = arith.constant dense<0.000000e+00> : vector<4x256xf32>
    %120 = tpu.matmul %119, %74, %cst_54 {dimension_numbers = #tpu.dot_dimension_numbers<[1], [0], [0], [1], [0, 0, 1, 1], [], []>} : vector<4x52xf32>, vector<52x256xf32>, vector<4x256xf32> -> vector<4x256xf32>
    %121 = arith.addf %117, %120 : vector<4x256xf32>
    %c7 = arith.constant 7 : index
    %c0_55 = arith.constant 0 : index
    %c0_56 = arith.constant 0 : index
    %122 = vector.load %arg2[%c7, %c0_55, %c0_56] : memref<13x4x52xf32, #tpu.memory_space<vmem>>, vector<1x4x52xf32>
    %123 = vector.shape_cast %122 : vector<1x4x52xf32> to vector<4x52xf32>
    %cst_57 = arith.constant dense<0.000000e+00> : vector<4x256xf32>
    %124 = tpu.matmul %123, %74, %cst_57 {dimension_numbers = #tpu.dot_dimension_numbers<[1], [0], [0], [1], [0, 0, 1, 1], [], []>} : vector<4x52xf32>, vector<52x256xf32>, vector<4x256xf32> -> vector<4x256xf32>
    %125 = vector.extract_strided_slice %124 {offsets = [0, 16], sizes = [4, 240], strides = [1, 1]} : vector<4x256xf32> to vector<4x240xf32>
    %126 = vector.extract_strided_slice %124 {offsets = [0, 0], sizes = [4, 16], strides = [1, 1]} : vector<4x256xf32> to vector<4x16xf32>
    %127 = tpu.concatenate %125, %126 in 1 : vector<4x240xf32>, vector<4x16xf32> -> vector<4x256xf32>
    %128 = arith.addf %121, %127 : vector<4x256xf32>
    %c8_58 = arith.constant 8 : index
    %c0_59 = arith.constant 0 : index
    %c0_60 = arith.constant 0 : index
    %129 = vector.load %arg2[%c8_58, %c0_59, %c0_60] : memref<13x4x52xf32, #tpu.memory_space<vmem>>, vector<1x4x52xf32>
    %130 = vector.shape_cast %129 : vector<1x4x52xf32> to vector<4x52xf32>
    %cst_61 = arith.constant dense<0.000000e+00> : vector<4x256xf32>
    %131 = tpu.matmul %130, %74, %cst_61 {dimension_numbers = #tpu.dot_dimension_numbers<[1], [0], [0], [1], [0, 0, 1, 1], [], []>} : vector<4x52xf32>, vector<52x256xf32>, vector<4x256xf32> -> vector<4x256xf32>
    %132 = vector.extract_strided_slice %131 {offsets = [0, 32], sizes = [4, 224], strides = [1, 1]} : vector<4x256xf32> to vector<4x224xf32>
    %133 = vector.extract_strided_slice %131 {offsets = [0, 0], sizes = [4, 32], strides = [1, 1]} : vector<4x256xf32> to vector<4x32xf32>
    %134 = tpu.concatenate %132, %133 in 1 : vector<4x224xf32>, vector<4x32xf32> -> vector<4x256xf32>
    %135 = arith.addf %128, %134 : vector<4x256xf32>
    %c9 = arith.constant 9 : index
    %c0_62 = arith.constant 0 : index
    %c0_63 = arith.constant 0 : index
    %136 = vector.load %arg2[%c9, %c0_62, %c0_63] : memref<13x4x52xf32, #tpu.memory_space<vmem>>, vector<1x4x52xf32>
    %137 = vector.shape_cast %136 : vector<1x4x52xf32> to vector<4x52xf32>
    %cst_64 = arith.constant dense<0.000000e+00> : vector<4x256xf32>
    %138 = tpu.matmul %137, %74, %cst_64 {dimension_numbers = #tpu.dot_dimension_numbers<[1], [0], [0], [1], [0, 0, 1, 1], [], []>} : vector<4x52xf32>, vector<52x256xf32>, vector<4x256xf32> -> vector<4x256xf32>
    %139 = vector.extract_strided_slice %138 {offsets = [0, 48], sizes = [4, 208], strides = [1, 1]} : vector<4x256xf32> to vector<4x208xf32>
    %140 = vector.extract_strided_slice %138 {offsets = [0, 0], sizes = [4, 48], strides = [1, 1]} : vector<4x256xf32> to vector<4x48xf32>
    %141 = tpu.concatenate %139, %140 in 1 : vector<4x208xf32>, vector<4x48xf32> -> vector<4x256xf32>
    %142 = arith.addf %135, %141 : vector<4x256xf32>
    %c10 = arith.constant 10 : index
    %c0_65 = arith.constant 0 : index
    %c0_66 = arith.constant 0 : index
    %143 = vector.load %arg2[%c10, %c0_65, %c0_66] : memref<13x4x52xf32, #tpu.memory_space<vmem>>, vector<1x4x52xf32>
    %144 = vector.shape_cast %143 : vector<1x4x52xf32> to vector<4x52xf32>
    %cst_67 = arith.constant dense<0.000000e+00> : vector<4x256xf32>
    %145 = tpu.matmul %144, %74, %cst_67 {dimension_numbers = #tpu.dot_dimension_numbers<[1], [0], [0], [1], [0, 0, 1, 1], [], []>} : vector<4x52xf32>, vector<52x256xf32>, vector<4x256xf32> -> vector<4x256xf32>
    %146 = vector.extract_strided_slice %145 {offsets = [0, 64], sizes = [4, 192], strides = [1, 1]} : vector<4x256xf32> to vector<4x192xf32>
    %147 = vector.extract_strided_slice %145 {offsets = [0, 0], sizes = [4, 64], strides = [1, 1]} : vector<4x256xf32> to vector<4x64xf32>
    %148 = tpu.concatenate %146, %147 in 1 : vector<4x192xf32>, vector<4x64xf32> -> vector<4x256xf32>
    %149 = arith.addf %142, %148 : vector<4x256xf32>
    %c11 = arith.constant 11 : index
    %c0_68 = arith.constant 0 : index
    %c0_69 = arith.constant 0 : index
    %150 = vector.load %arg2[%c11, %c0_68, %c0_69] : memref<13x4x52xf32, #tpu.memory_space<vmem>>, vector<1x4x52xf32>
    %151 = vector.shape_cast %150 : vector<1x4x52xf32> to vector<4x52xf32>
    %cst_70 = arith.constant dense<0.000000e+00> : vector<4x256xf32>
    %152 = tpu.matmul %151, %74, %cst_70 {dimension_numbers = #tpu.dot_dimension_numbers<[1], [0], [0], [1], [0, 0, 1, 1], [], []>} : vector<4x52xf32>, vector<52x256xf32>, vector<4x256xf32> -> vector<4x256xf32>
    %153 = vector.extract_strided_slice %152 {offsets = [0, 80], sizes = [4, 176], strides = [1, 1]} : vector<4x256xf32> to vector<4x176xf32>
    %154 = vector.extract_strided_slice %152 {offsets = [0, 0], sizes = [4, 80], strides = [1, 1]} : vector<4x256xf32> to vector<4x80xf32>
    %155 = tpu.concatenate %153, %154 in 1 : vector<4x176xf32>, vector<4x80xf32> -> vector<4x256xf32>
    %156 = arith.addf %149, %155 : vector<4x256xf32>
    %c12_71 = arith.constant 12 : index
    %c0_72 = arith.constant 0 : index
    %c0_73 = arith.constant 0 : index
    %157 = vector.load %arg2[%c12_71, %c0_72, %c0_73] : memref<13x4x52xf32, #tpu.memory_space<vmem>>, vector<1x4x52xf32>
    %158 = vector.shape_cast %157 : vector<1x4x52xf32> to vector<4x52xf32>
    %cst_74 = arith.constant dense<0.000000e+00> : vector<4x256xf32>
    %159 = tpu.matmul %158, %74, %cst_74 {dimension_numbers = #tpu.dot_dimension_numbers<[1], [0], [0], [1], [0, 0, 1, 1], [], []>} : vector<4x52xf32>, vector<52x256xf32>, vector<4x256xf32> -> vector<4x256xf32>
    %160 = vector.extract_strided_slice %159 {offsets = [0, 96], sizes = [4, 160], strides = [1, 1]} : vector<4x256xf32> to vector<4x160xf32>
    %161 = vector.extract_strided_slice %159 {offsets = [0, 0], sizes = [4, 96], strides = [1, 1]} : vector<4x256xf32> to vector<4x96xf32>
    %162 = tpu.concatenate %160, %161 in 1 : vector<4x160xf32>, vector<4x96xf32> -> vector<4x256xf32>
    %163 = arith.addf %156, %162 : vector<4x256xf32>
    %c0_75 = arith.constant 0 : index
    %c0_76 = arith.constant 0 : index
    %164 = vector.load %arg3[%c0_75, %c0_76] : memref<4x1xf32, #tpu.memory_space<vmem>>, vector<4x1xf32>
    %165 = vector.broadcast %164 : vector<4x1xf32> to vector<4x256xf32>
    %166 = arith.addf %163, %165 : vector<4x256xf32>
    %cst_77 = arith.constant 0.000000e+00 : f32
    %167 = vector.broadcast %cst_77 : f32 to vector<4x256xf32>
    %168 = arith.cmpf ogt, %166, %167 : vector<4x256xf32>
    %cst_78 = arith.constant 0.000000e+00 : f32
    %169 = vector.broadcast %cst_78 : f32 to vector<4x256xf32>
    %170 = arith.minimumf %166, %169 : vector<4x256xf32>
    %171 = math.exp %170 : vector<4x256xf32>
    %cst_79 = arith.constant 1.000000e+00 : f32
    %172 = vector.broadcast %cst_79 : f32 to vector<4x256xf32>
    %173 = arith.subf %171, %172 : vector<4x256xf32>
    %174 = arith.select %168, %166, %173 : vector<4x256xi1>, vector<4x256xf32>
    %175 = tpu.iota {dimensions = array<i32: 1>} : vector<4x256xi32>
    %c102_i32 = arith.constant 102 : i32
    %176 = vector.broadcast %c102_i32 : i32 to vector<4x256xi32>
    %177 = arith.cmpi sge, %175, %176 : vector<4x256xi32>
    %c106_i32 = arith.constant 106 : i32
    %178 = vector.broadcast %c106_i32 : i32 to vector<4x256xi32>
    %179 = arith.cmpi slt, %175, %178 : vector<4x256xi32>
    %180 = arith.andi %177, %179 : vector<4x256xi1>
    %c118_i32 = arith.constant 118 : i32
    %181 = vector.broadcast %c118_i32 : i32 to vector<4x256xi32>
    %182 = arith.cmpi sge, %175, %181 : vector<4x256xi32>
    %c122_i32 = arith.constant 122 : i32
    %183 = vector.broadcast %c122_i32 : i32 to vector<4x256xi32>
    %184 = arith.cmpi slt, %175, %183 : vector<4x256xi32>
    %185 = arith.andi %182, %184 : vector<4x256xi1>
    %186 = arith.ori %180, %185 : vector<4x256xi1>
    %c134_i32 = arith.constant 134 : i32
    %187 = vector.broadcast %c134_i32 : i32 to vector<4x256xi32>
    %188 = arith.cmpi sge, %175, %187 : vector<4x256xi32>
    %c138_i32 = arith.constant 138 : i32
    %189 = vector.broadcast %c138_i32 : i32 to vector<4x256xi32>
    %190 = arith.cmpi slt, %175, %189 : vector<4x256xi32>
    %191 = arith.andi %188, %190 : vector<4x256xi1>
    %192 = arith.ori %186, %191 : vector<4x256xi1>
    %c150_i32 = arith.constant 150 : i32
    %193 = vector.broadcast %c150_i32 : i32 to vector<4x256xi32>
    %194 = arith.cmpi sge, %175, %193 : vector<4x256xi32>
    %c154_i32 = arith.constant 154 : i32
    %195 = vector.broadcast %c154_i32 : i32 to vector<4x256xi32>
    %196 = arith.cmpi slt, %175, %195 : vector<4x256xi32>
    %197 = arith.andi %194, %196 : vector<4x256xi1>
    %198 = arith.ori %192, %197 : vector<4x256xi1>
    %cst_80 = arith.constant 0.000000e+00 : f32
    %199 = vector.broadcast %cst_80 : f32 to vector<4x256xf32>
    %200 = arith.select %198, %174, %199 : vector<4x256xi1>, vector<4x256xf32>
    %201 = arith.addf %24, %200 : vector<4x256xf32>
    %c0_81 = arith.constant 0 : index
    %c0_82 = arith.constant 0 : index
    %c0_83 = arith.constant 0 : index
    %202 = vector.load %arg8[%c0_81, %c0_82, %c0_83] : memref<1x4x256xf32, #tpu.memory_space<vmem>>, vector<1x4x256xf32>
    %203 = vector.shape_cast %202 : vector<1x4x256xf32> to vector<4x256xf32>
    %204 = vector.shape_cast %201 : vector<4x256xf32> to vector<1x4x256xf32>
    tpu.vector_store %arg8[%c0_81, %c0_82, %c0_83], %204 {strides = array<i32>} : memref<1x4x256xf32, #tpu.memory_space<vmem>>, vector<1x4x256xf32>,
    return
  }
  func.func @transform_0(%arg0: i32) -> (i32, i32, i32) {
    %c0_i32 = arith.constant 0 : i32
    %c0_i32_0 = arith.constant 0 : i32
    %c0_i32_1 = arith.constant 0 : i32
    return %arg0, %c0_i32, %c0_i32_0 : i32, i32, i32
  }
  func.func @transform_1(%arg0: i32) -> (i32, i32, i32) {
    %c0_i32 = arith.constant 0 : i32
    %c0_i32_0 = arith.constant 0 : i32
    %c0_i32_1 = arith.constant 0 : i32
    %c0_i32_2 = arith.constant 0 : i32
    return %c0_i32, %c0_i32_0, %c0_i32_1 : i32, i32, i32
  }
  func.func @transform_2(%arg0: i32) -> (i32, i32) {
    %c0_i32 = arith.constant 0 : i32
    %c0_i32_0 = arith.constant 0 : i32
    %c0_i32_1 = arith.constant 0 : i32
    return %c0_i32, %c0_i32_0 : i32, i32
  }
  func.func @transform_3(%arg0: i32) -> (i32, i32) {
    %c0_i32 = arith.constant 0 : i32
    %c0_i32_0 = arith.constant 0 : i32
    %c0_i32_1 = arith.constant 0 : i32
    return %c0_i32, %c0_i32_0 : i32, i32
  }
  func.func @transform_4(%arg0: i32) -> (i32, i32) {
    %c0_i32 = arith.constant 0 : i32
    %c0_i32_0 = arith.constant 0 : i32
    %c0_i32_1 = arith.constant 0 : i32
    return %c0_i32, %c0_i32_0 : i32, i32
  }
  func.func @transform_5(%arg0: i32) -> (i32, i32) {
    %c0_i32 = arith.constant 0 : i32
    %c0_i32_0 = arith.constant 0 : i32
    %c0_i32_1 = arith.constant 0 : i32
    return %c0_i32, %c0_i32_0 : i32, i32
  }
  func.func @transform_6(%arg0: i32) -> (i32, i32) {
    %c0_i32 = arith.constant 0 : i32
    %c0_i32_0 = arith.constant 0 : i32
    %c0_i32_1 = arith.constant 0 : i32
    return %c0_i32, %c0_i32_0 : i32, i32
  }
  func.func @transform_7(%arg0: i32) -> (i32, i32, i32) {
    %c0_i32 = arith.constant 0 : i32
    %c0_i32_0 = arith.constant 0 : i32
    %c0_i32_1 = arith.constant 0 : i32
    return %arg0, %c0_i32, %c0_i32_0 : i32, i32, i32
  }
}

</mosaic_0001>

<bundles_post_ra>
// kernel: tpu_custom_call.1
= control target key start
LH: loop header
LB: loop body
LE: loop exit
PB: predicated region body
PF: predicated region fallthrough
CT: control target
= control target key end

     0   :  { %12 = vsyncpa [#allocation4], 0  ;;  %s2506_s0 = inlined_call_operand.vmem [shape: f32[2,4,256], index: 0, kind: input, shape index: {}]   ;;  %s2507_s1 = inlined_call_operand.hbm [shape: f32[13,4,52], index: 1, kind: input, shape index: {}]   ;;  %s2508_s2 = inlined_call_operand.vmem [shape: f32[4,1], index: 2, kind: input, shape index: {}]   ;;  %s2509_s3 = inlined_call_operand.vmem [shape: f32[16,4], index: 3, kind: input, shape index: {}]   ;;  %s2510_s4 = inlined_call_operand.vmem [shape: f32[16,1], index: 4, kind: input, shape index: {}]   ;;  %s2511_s5 = inlined_call_operand.vmem [shape: f32[4,16], index: 5, kind: input, shape index: {}]   ;;  %s2512_s6 = inlined_call_operand.vmem [shape: f32[4,1], index: 6, kind: input, shape index: {}]   ;;  %s2513_s7 = inlined_call_operand.hbm [shape: f32[2,4,256], index: 7, kind: output, shape index: {}]  }
   0x1   :  { %13 = vsyncpa [#allocation5], 0 }
   0x2   :  { %15 = vsyncpa [#allocation5 + $0x1], 0  ;;  %s1961_s24 = smov 0   ;;  %s1963_s25 = smov 0  }
   0x3   :  { %s1965_s26 = smov 0   ;;  %s1967_s27 = smov 0  }
   0x4 LB: > { %s1982_s28 = sadd.s32 4294967295, %s1896_s27   ;;  %s1636_s29 = sadd.s32 4294967294, %s1896_s27   ;;  %s1896_s27 = sphi %s1967_s27, %s2527_s27   ;;  %s1892_s26 = sphi %s1965_s26, %s2526_s26   ;;  %s1888_s25 = sphi %s1963_s25, %s2525_s25   ;;  %s1884_s24 = sphi %s1961_s24, %s2524_s24  }
   0x5   : > { %s1986_s30 = sadd.s32 1, %s1896_s27   ;;  %s180_s8 = sadd.s32 1, %s1892_s26 }
   0x6   : > { %s177_s9 = ssub.s32 %s1896_s27, %s1986_s30  ;;  %p190_p0 = scmp.ne.s32.totalorder %s1892_s26, %s1888_s25 }
   0x7   : > { %p178_p1 = scmp.eq.s32.totalorder %s177_s9, 0  ;;  %p191_p2 = scmp.eq.s32.totalorder %s1982_s28, 1 }
   0x8   : > { %p196_p3 = scmp.ne.s32.totalorder %s1888_s25, %s1884_s24  ;;  %p197_p4 = scmp.eq.s32.totalorder %s1636_s29, 1 }
   0x9   : > { %s1997_s10 = scalar_select %p178_p1, %s1892_s26, %s180_s8  }
   0xa   : > { %p1999_p5 = por %p191_p2, %p190_p0  ;;  %p2003_p6 = por %p197_p4, %p196_p3 }
   0xb   : > { %p1637_p7 = scmp.ge.s32.totalorder %s1896_s27, 1  ;;  %p204_p8 = scmp.lt.s32.totalorder %s1896_s27, 3 }
   0xc   : > { %p1728_p9 = scmp.eq.s32.totalorder %s1982_s28, 0  ;;  %s215_s15 = sshll.u32 %s2507_s1, 4  ;;  %s216_s15 = int_to_ptr.hbm [resolvable:$true] %s215_s15 }
   0xd   : > { %p205_p10 = pnand %p1637_p7, %p204_p8  ;;  %s1898_s16 = smov [#allocation3]  }
   0xe   : > { %s217_s17 = sshll.u32 %s1898_s16, 4  ;;  %s1899_s18 = smov 64   ;;  %s218_s17 = int_to_ptr.vmem [resolvable:$true] %s217_s17 }
   0xf   : > { %p1720_p11 = pneg %p205_p10  ;;  %s1900_s19 = smov 4  }
  0x10   : > { %256 = sbr.rel (%p205_p10) target bundleno = 741 (0x2e5), region = 48 }
  0x11   : > { %p1721_p12 = pnand %p1728_p9, %p1720_p11 }
  0x13   : > { %1723 = dma.hbm_to_vmem [thread:$0]  (!%p1721_p12), %s216_s15, 832, %s218_s17, [#allocation4], %s1899_s18, %s1899_s18, %s1900_s19  }
  0x15   : > { %1875 = dma.done.wait (%p1728_p9), [#allocation4], 832  }
  0x16   : > { %1877 = vsyncadd (%p1728_p9), [#allocation4], 4294966464  ;;  %p289_p13 = scmp.lt.s32.totalorder %s1982_s28, 1  ;;  %v1901_v0 = vmov 0   ;;  %v298_v2 = vld [vmem:[%s2510_s4 + $0x8] sm:$0xff]  ;;  %vm320_vm0 = vcmask 1043456  }
  0x17   : > { %1786 = vset.pattern.permute.xlu0 %v1901_v0  ;;  %1787 = vset.pattern.permute.xlu2 %v1901_v0  ;;  %v295_v3 = vld [vmem:[%s2509_s3] sm:$0xff]  ;;  %vm313_vm1 = vcmask 31744   ;;  %v296_v7 = vld [vmem:[%s2509_s3 + $0x8] sm:$0xff]  ;;  %s1902_s19 = smov 5   ;;  %s1905_s22 = smov 1   ;;  %vm489_vm2 = vcmask 39936  }
  0x18   : > { %s290_s20 = scalar_select %p289_p13, %s1982_s28, 1  ;;  %306 = vperm.xlu0 %1786, %v298_v2   ;;  %v297_v4 = vld [vmem:[%s2510_s4] sm:$0xff]  ;;  %vm530_vm3 = vcmask 23552   ;;  %vm553_vm4 = vcmask 15360   ;;  %vm572_vm5 = vcmask 7168   ;;  %vm597_vm6 = vcmask 1039360  }
  0x19   : > { %s1906_s23 = smov 127   ;;  %s1908_s8 = smov 125   ;;  %vm620_vm7 = vcmask 1031168   ;;  %vm639_vm8 = vcmask 1022976   ;;  %vm662_vm9 = vcmask 1014784   ;;  %vm681_vm10 = vcmask 1006592  }
  0x1a   : > { %s1712_s21 = sshll.u32 %s290_s20, 3  ;;  %s1903_s20 = smov 3   ;;  %vm414_vm11 = vcmask 130048   ;;  %vm704_vm12 = vcmask 998400   ;;  %vm470_vm13 = vcmask 48128   ;;  %vm731_vm14 = vcmask 424960  }
  0x1b   : > { %s293_s29 = scalar_lea.vmem %s2506_s0, %s1712_s21  ;;  %s1904_s21 = smov 2   ;;  %vm847_vm15 = vcmask 654336  }
  0x1c   : > { %v2024_v1 = vld [vmem:[%s293_s29] sm:$0xff]  ;;  %s1907_s29 = smov 126   ;;  %s1909_s9 = smov 124  }
  0x1d   : > { %310 = vst [vmem:[#allocation1] ss:$2 sm:$0xff] %v2024_v1  ;;  %s1910_s13 = smov 123   ;;  %s1911_s14 = smov 122  }
  0x1e   : > { %s1912_s15 = smov 4   ;;  %s1913_s16 = smov 6  }
  0x1f   : > { %s1713_s18 = sshll.u32 %s1982_s28, 3 }
  0x20   : > { %301 = vperm.xlu0 %1786, %v297_v4   ;;  %s1560_s28 = scalar_lea.hbm %s2513_s7, %s1713_s18 }
  0x24   : > { %v311_v5 = vld.sshfl [vmem:[#allocation1] sm:$0xff pattern:$0x75316420]  ;;  %v312_v6 = vld.sshfl [vmem:[#allocation1 + $0x8] sm:$0xff pattern:$0x75316420] }
  0x25   : > { %1645 = vmatpush.msk.msra.mxu0 %vm320_vm0, %v311_v5  ;;  %1648 = vmatpush.msk.msra.mxu1 %vm320_vm0, %v312_v6  ;;  %458 = vst [vmem:[#allocation1] ss:$2 sm:$0xff] %v2024_v1 }
  0x26   : > { %1646 = vmatmul.msk.f32.vlgmr.msra.gmra.mxu0 %vm313_vm1, %v295_v3  ;;  %1649 = vmatmul.msk.f32.vlgmr.msra.gmra.mxu1 %vm313_vm1, %v295_v3 }
  0x2c   : > { %v2044_v8 = vld.sshfl [vmem:[#allocation1 + $0x8] sm:$0xff pattern:$0x75316420] }
  0x2d   : > { %463 = vst [vmem:[#allocation1] ss:$2 sm:$0xff] %v2024_v1 }
  0x2e   : > { %1647 = vmatmul.msk.f32.gmra.mxu0 %vm313_vm1, %v296_v7  ;;  %1650 = vmatmul.msk.f32.gmra.mxu1 %vm313_vm1, %v296_v7 }
  0x34   : > { %v2049_v9 = vld.sshfl [vmem:[#allocation1] sm:$0xff pattern:$0x75316420]  ;;  %v2051_v10 = vld.sshfl [vmem:[#allocation1 + $0x8] sm:$0xff pattern:$0x75316420] }
  0x35   : > { %477 = vst [vmem:[#allocation1] ss:$2 sm:$0xff] %v2024_v1 }
  0x3c   : > { %v478_v11 = vld.sshfl [vmem:[#allocation1 + $0x8] sm:$0xff pattern:$0x75316420] }
  0x3d   : > { %482 = vst [vmem:[#allocation1] ss:$2 sm:$0xff] %v2024_v1  ;;  %479 = vrot.lane.b32.xlu2 %v478_v11, %s1902_s19 }
  0x44   : > { %v484_v12 = vld.sshfl [vmem:[#allocation1 + $0x8] sm:$0xff pattern:$0x75316420]  ;;  %v483_v13 = vld.sshfl [vmem:[#allocation1] sm:$0xff pattern:$0x75316420] }
  0x45   : > { %487 = vrot.lane.b32.xlu1 %v484_v12, %s1902_s19  ;;  %485 = vrot.lane.b32.xlu0 %v483_v13, %s1902_s19  ;;  %500 = vst [vmem:[#allocation1] ss:$2 sm:$0xff] %v2024_v1  ;;  %s1914_s19 = smov 96  }
  0x4c   : > { %v2056_v14 = vld.sshfl [vmem:[#allocation1 + $0x8] sm:$0xff pattern:$0x75316420] }
  0x4d   : > { %505 = vst [vmem:[#allocation1] ss:$2 sm:$0xff] %v2024_v1 }
  0x54   : > { %v2059_v15 = vld.sshfl [vmem:[#allocation1] sm:$0xff pattern:$0x75316420]  ;;  %v2061_v16 = vld.sshfl [vmem:[#allocation1 + $0x8] sm:$0xff pattern:$0x75316420] }
  0x55   : > { %518 = vst [vmem:[#allocation1] ss:$2 sm:$0xff] %v2024_v1 }
  0x5c   : > { %v519_v17 = vld.sshfl [vmem:[#allocation1 + $0x8] sm:$0xff pattern:$0x75316420] }
  0x5d   : > { %523 = vst [vmem:[#allocation1] ss:$2 sm:$0xff] %v2024_v1  ;;  %520 = vrot.lane.b32.xlu2 %v519_v17, %s1903_s20 }
  0x64   : > { %v525_v18 = vld.sshfl [vmem:[#allocation1 + $0x8] sm:$0xff pattern:$0x75316420]  ;;  %v524_v19 = vld.sshfl [vmem:[#allocation1] sm:$0xff pattern:$0x75316420] }
  0x65   : > { %528 = vrot.lane.b32.xlu1 %v525_v18, %s1903_s20  ;;  %526 = vrot.lane.b32.xlu0 %v524_v19, %s1903_s20  ;;  %541 = vst [vmem:[#allocation1] ss:$2 sm:$0xff] %v2024_v1  ;;  %s1915_s20 = smov 80  }
  0x6c   : > { %v542_v20 = vld.sshfl [vmem:[#allocation1 + $0x8] sm:$0xff pattern:$0x75316420] }
  0x6d   : > { %546 = vst [vmem:[#allocation1] ss:$2 sm:$0xff] %v2024_v1  ;;  %543 = vrot.lane.b32.xlu2 %v542_v20, %s1904_s21 }
  0x74   : > { %v548_v21 = vld.sshfl [vmem:[#allocation1 + $0x8] sm:$0xff pattern:$0x75316420]  ;;  %v547_v22 = vld.sshfl [vmem:[#allocation1] sm:$0xff pattern:$0x75316420] }
  0x75   : > { %551 = vrot.lane.b32.xlu1 %v548_v21, %s1904_s21  ;;  %549 = vrot.lane.b32.xlu0 %v547_v22, %s1904_s21  ;;  %560 = vst [vmem:[#allocation1] ss:$2 sm:$0xff] %v2024_v1  ;;  %s1916_s21 = smov 64  }
  0x7c   : > { %v561_v23 = vld.sshfl [vmem:[#allocation1 + $0x8] sm:$0xff pattern:$0x75316420] }
  0x7d   : > { %565 = vst [vmem:[#allocation1] ss:$2 sm:$0xff] %v2024_v1  ;;  %562 = vrot.lane.b32.xlu2 %v561_v23, %s1905_s22 }
  0x84   : > { %v567_v24 = vld.sshfl [vmem:[#allocation1 + $0x8] sm:$0xff pattern:$0x75316420]  ;;  %v566_v25 = vld.sshfl [vmem:[#allocation1] sm:$0xff pattern:$0x75316420] }
  0x85   : > { %570 = vrot.lane.b32.xlu1 %v567_v24, %s1905_s22  ;;  %583 = vst [vmem:[#allocation1] ss:$2 sm:$0xff] %v2024_v1  ;;  %568 = vrot.lane.b32.xlu0 %v566_v25, %s1905_s22  ;;  %s1917_s22 = smov 48  }
  0x8a   : > { %v307_v42 = vpop.permute.xlu0 %306 }
  0x8c   : > { %v584_v26 = vld.sshfl [vmem:[#allocation1] sm:$0xff pattern:$0x75316420]  ;;  %v585_v27 = vld.sshfl [vmem:[#allocation1 + $0x8] sm:$0xff pattern:$0x75316420] }
  0x8d   : > { %590 = vst [vmem:[#allocation1] ss:$2 sm:$0xff] %v2024_v1 }
  0x8e   : > { %588 = vst [vmem:[#allocation2 + $0x8] sm:$0xf] %v584_v26 }
  0x8f   : > { %589 = vst [vmem:[#allocation2 + $0x48] sm:$0xf] %v585_v27 }
  0x92   : > { %v302_v45 = vpop.permute.xlu0 %301 }
  0x94   : > { %v591_v28 = vld.sshfl [vmem:[#allocation1] sm:$0xff pattern:$0x75316420]  ;;  %v592_v29 = vld.sshfl [vmem:[#allocation1 + $0x8] sm:$0xff pattern:$0x75316420] }
  0x95   : > { %595 = vrot.lane.b32.xlu0 %v592_v29, %s1906_s23  ;;  %600 = vst [vmem:[#allocation1] ss:$2 sm:$0xff] %v2024_v1  ;;  %593 = vrot.lane.b32.xlu2 %v591_v28, %s1906_s23 }
  0x97   : > { %v480_v54 = vpop.permute.xlu2 %479 }
  0x9c   : > { %v601_v30 = vld.sshfl [vmem:[#allocation1] sm:$0xff pattern:$0x75316420] }
  0x9d   : > { %602 = vrot.lane.b32.xlu1 %v601_v30, %s1906_s23  ;;  %613 = vst [vmem:[#allocation1] ss:$2 sm:$0xff] %v2024_v1  ;;  %s1918_s23 = smov 16  }
  0xa3   : > { %v342_v40 = vpop.f32.mrf.mxu0  ;;  %v365_v41 = vpop.f32.mrf.mxu1 }
  0xa4   : > { %v614_v31 = vld.sshfl [vmem:[#allocation1] sm:$0xff pattern:$0x75316420]  ;;  %v615_v32 = vld.sshfl [vmem:[#allocation1 + $0x8] sm:$0xff pattern:$0x75316420]  ;;  %v2082_v50 = vadd.f32 %v365_v41, %v302_v45  ;;  %v2085_v52 = vadd.f32 %v342_v40, %v302_v45 }
  0xa5   : > { %618 = vrot.lane.b32.xlu0 %v615_v32, %s1907_s29  ;;  %624 = vst [vmem:[#allocation1] ss:$2 sm:$0xff] %v2024_v1  ;;  %616 = vrot.lane.b32.xlu2 %v614_v31, %s1907_s29 }
  0xa6   : > { %v376_v60 = vmul.f32 0.044715, %v2082_v50  ;;  %v375_v3 = vmul.f32 0.044715, %v2085_v52  ;;  %v372_v40 = vmul.f32 0.5, %v2082_v50 }
  0xa8   : > { %v380_v2 = vmul.f32 %v376_v60, %v2082_v50  ;;  %v379_v7 = vmul.f32 %v375_v3, %v2085_v52 }
  0xaa   : > { %v384_v6 = vmul.f32 %v380_v2, %v2082_v50  ;;  %v383_v21 = vmul.f32 %v379_v7, %v2085_v52 }
  0xab   : > { %v345_v46 = vpop.f32.mrf.mxu0  ;;  %v368_v47 = vpop.f32.mrf.mxu1 }
  0xac   : > { %v625_v33 = vld.sshfl [vmem:[#allocation1] sm:$0xff pattern:$0x75316420]  ;;  %v346_v48 = vadd.f32 %v345_v46, %v307_v42  ;;  %v2080_v49 = vadd.f32 %v368_v47, %v307_v42  ;;  %v388_v20 = vadd.f32 %v384_v6, %v2082_v50  ;;  %v387_v28 = vadd.f32 %v383_v21, %v2085_v52 }
  0xad   : > { %626 = vrot.lane.b32.xlu1 %v625_v33, %s1907_s29  ;;  %632 = vst [vmem:[#allocation1] ss:$2 sm:$0xff] %v2024_v1  ;;  %s1919_s29 = smov 32  }
  0xae   : > { %v377_v56 = vmul.f32 0.044715, %v346_v48  ;;  %v378_v57 = vmul.f32 0.044715, %v2080_v49  ;;  %v392_v27 = vmul.f32 0.7978846, %v388_v20 }
  0xaf   : > { %v391_v30 = vmul.f32 0.7978846, %v387_v28  ;;  %v373_v32 = vmul.f32 0.5, %v346_v48 }
  0xb0   : > { %v381_v63 = vmul.f32 %v377_v56, %v346_v48  ;;  %v382_v0 = vmul.f32 %v378_v57, %v2080_v49 }
  0xb2   : > { %v385_v4 = vmul.f32 %v381_v63, %v346_v48  ;;  %v386_v5 = vmul.f32 %v382_v0, %v2080_v49 }
  0xb4   : > { %v634_v34 = vld.sshfl [vmem:[#allocation1 + $0x8] sm:$0xff pattern:$0x75316420]  ;;  %v633_v35 = vld.sshfl [vmem:[#allocation1] sm:$0xff pattern:$0x75316420]  ;;  %v389_v13 = vadd.f32 %v385_v4, %v346_v48  ;;  %v390_v17 = vadd.f32 %v386_v5, %v2080_v49 }
  0xb5   : > { %637 = vrot.lane.b32.xlu0 %v634_v34, %s1908_s8  ;;  %642 = vst [vmem:[#allocation1] ss:$2 sm:$0xff] %v2024_v1  ;;  %635 = vrot.lane.b32.xlu2 %v633_v35, %s1908_s8 }
  0xb6   : > { %v393_v23 = vmul.f32 0.7978846, %v389_v13  ;;  %v394_v24 = vmul.f32 0.7978846, %v390_v17 }
  0xb7   : > { %v488_v53 = vpop.permute.xlu1 %487  ;;  %v486_v55 = vpop.permute.xlu0 %485 }
  0xb8   : > { %v490_v58 = vsel %vm489_vm2, %v486_v55, %v488_v53  ;;  %v492_v59 = vsel %vm489_vm2, %v480_v54, %v486_v55  ;;  %v521_v19 = vpop.permute.xlu2 %520  ;;  %1788 = vtanh.f32 %v393_v23  ;;  %vm906_vm2 = vcmask 523264  }
  0xb9   : > { %v495_v61 = vrot.slane %v490_v58, 4  ;;  %v494_v62 = vrot.slane %v492_v59, 4  ;;  %1790 = vtanh.f32 %v394_v24  ;;  %v407_v24 = vld [vmem:[%s2511_s5] sm:$0xf] }
  0xba   : > { %1792 = vtanh.f32 %v392_v27 }
  0xbb   : > { %499 = vst [vmem:[#allocation2] sm:$0xf0] %v495_v61  ;;  %1794 = vtanh.f32 %v391_v30 }
  0xbc   : > { %v643_v36 = vld.sshfl [vmem:[#allocation1] sm:$0xff pattern:$0x75316420]  ;;  %498 = vst [vmem:[#allocation2 + $0x30] sm:$0xf0] %v494_v62 }
  0xbd   : > { %644 = vrot.lane.b32.xlu1 %v643_v36, %s1908_s8  ;;  %655 = vst [vmem:[#allocation1] ss:$2 sm:$0xff] %v2024_v1  ;;  %v374_v36 = vmul.f32 0.5, %v2080_v49  ;;  %s1920_s8 = smov 112  }
  0xbe   : > { %v1789_v35 = vpop.eup %1788 }
  0xc4   : > { %v656_v37 = vld.sshfl [vmem:[#allocation1] sm:$0xff pattern:$0x75316420]  ;;  %v657_v38 = vld.sshfl [vmem:[#allocation1 + $0x8] sm:$0xff pattern:$0x75316420] }
  0xc5   : > { %666 = vst [vmem:[#allocation1] ss:$2 sm:$0xff] %v2024_v1  ;;  %660 = vrot.lane.b32.xlu0 %v657_v38, %s1909_s9  ;;  %658 = vrot.lane.b32.xlu2 %v656_v37, %s1909_s9  ;;  %v1791_v38 = vpop.eup %1790 }
  0xc7   : > { %v544_v34 = vpop.permute.xlu2 %543 }
  0xcc   : > { %v667_v39 = vld.sshfl [vmem:[#allocation1] sm:$0xff pattern:$0x75316420] }
  0xcd   : > { %668 = vrot.lane.b32.xlu1 %v667_v39, %s1909_s9  ;;  %674 = vst [vmem:[#allocation1] ss:$2 sm:$0xff] %v2024_v1  ;;  %v401_v39 = vadd.f32 1.0, %v1789_v35 }
  0xcf   : > { %v405_v46 = vmul.f32 %v401_v39, %v373_v32 }
  0xd1   : > { %432 = vmatpush.msra.mxu2 %v405_v46 }
  0xd4   : > { %v675_v43 = vld.sshfl [vmem:[#allocation1] sm:$0xff pattern:$0x75316420]  ;;  %v676_v44 = vld.sshfl [vmem:[#allocation1 + $0x8] sm:$0xff pattern:$0x75316420] }
  0xd5   : > { %677 = vrot.lane.b32.xlu1 %v675_v43, %s1910_s13  ;;  %684 = vst [vmem:[#allocation1] ss:$2 sm:$0xff] %v2024_v1  ;;  %v1793_v43 = vpop.eup %1792 }
  0xd6   : > { %v1795_v45 = vpop.eup %1794  ;;  %v400_v47 = vadd.f32 1.0, %v1793_v43 }
  0xd7   : > { %v529_v18 = vpop.permute.xlu1 %528  ;;  %v527_v22 = vpop.permute.xlu0 %526 }
  0xd8   : > { %v531_v25 = vsel %vm530_vm3, %v527_v22, %v529_v18  ;;  %v533_v26 = vsel %vm530_vm3, %v521_v19, %v527_v22  ;;  %v404_v49 = vmul.f32 %v400_v47, %v372_v40  ;;  %v563_v50 = vpop.permute.xlu2 %562  ;;  %vm965_vm3 = vcmask 392192  }
  0xd9   : > { %v536_v29 = vrot.slane %v531_v25, 4 }
  0xdb   : > { %540 = vst [vmem:[#allocation2 + $0x18] sm:$0xf0] %v536_v29 }
  0xdc   : > { %v685_v51 = vld.sshfl [vmem:[#allocation1] sm:$0xff pattern:$0x75316420] }
  0xdd   : > { %679 = vrot.lane.b32.xlu1 %v676_v44, %s1910_s13  ;;  %697 = vst [vmem:[#allocation1] ss:$2 sm:$0xff] %v2024_v1  ;;  %686 = vrot.lane.b32.xlu2 %v685_v51, %s1910_s13  ;;  %v402_v44 = vadd.f32 1.0, %v1791_v38 }
  0xdf   : > { %v406_v48 = vmul.f32 %v402_v44, %v374_v36 }
  0xe1   : > { %452 = vmatpush.msra.mxu3 %v406_v48 }
  0xe3   : > { %453 = vmatpush.msra.mxu3 %v404_v49 }
  0xe4   : > { %v699_v11 = vld.sshfl [vmem:[#allocation1 + $0x8] sm:$0xff pattern:$0x75316420]  ;;  %v698_v12 = vld.sshfl [vmem:[#allocation1] sm:$0xff pattern:$0x75316420]  ;;  %1652 = vmatmul.msk.f32.vlgmr.msra.gmra.mxu3 %vm414_vm11, %v407_v24 }
  0xe5   : > { %702 = vrot.lane.b32.xlu0 %v699_v11, %s1911_s14  ;;  %708 = vst [vmem:[#allocation1] ss:$2 sm:$0xff] %v2024_v1  ;;  %700 = vrot.lane.b32.xlu2 %v698_v12, %s1911_s14  ;;  %v535_v1 = vrot.slane %v533_v26, 4 }
  0xe7   : > { %539 = vst [vmem:[#allocation2 + $0x58] sm:$0xf0] %v535_v1  ;;  %v552_v33 = vpop.permute.xlu1 %551  ;;  %v550_v37 = vpop.permute.xlu0 %549 }
  0xe8   : > { %v554_v41 = vsel %vm553_vm4, %v550_v37, %v552_v33  ;;  %v557_v42 = vsel %vm553_vm4, %v544_v34, %v550_v37  ;;  %vm1024_vm4 = vcmask 261120  }
  0xe9   : > { %559 = vst [vmem:[#allocation2 + $0x68] sm:$0xf] %v554_v41 }
  0xea   : > { %558 = vst [vmem:[#allocation2 + $0x50] sm:$0xf] %v557_v42 }
  0xec   : > { %v709_v31 = vld.sshfl [vmem:[#allocation1] sm:$0xff pattern:$0x75316420] }
  0xed   : > { %508 = vrot.lane.b32.xlu0 %v2059_v15, %s1912_s15  ;;  %710 = vrot.lane.b32.xlu1 %v709_v31, %s1911_s14  ;;  %v371_v15 = vmul.f32 0.5, %v2085_v52 }
  0xee   : > { %502 = vrot.lane.b32.xlu2 %v2056_v14, %s1912_s15  ;;  %v399_v14 = vadd.f32 1.0, %v1795_v45 }
  0xef   : > { %v594_v58 = vpop.permute.xlu2 %593 }
  0xf0   : > { %v403_v51 = vmul.f32 %v399_v14, %v371_v15 }
  0xf2   : > { %433 = vmatpush.msra.mxu2 %v403_v51 }
  0xf3   : > { %1651 = vmatmul.msk.f32.vlgmr.msra.gmra.mxu2 %vm414_vm11, %v407_v24 }
  0xf5   : > { %466 = vrot.lane.b32.xlu0 %v2049_v9, %s1913_s16  ;;  %510 = vrot.lane.b32.xlu1 %v2061_v16, %s1912_s15  ;;  %s1850_s15 = scalar_lea.hbm %s2513_s7, 16 }
  0xf6   : > { %460 = vrot.lane.b32.xlu2 %v2044_v8, %s1913_s16 }
  0xf7   : > { %v571_v52 = vpop.permute.xlu1 %570  ;;  %v569_v53 = vpop.permute.xlu0 %568 }
  0xf8   : > { %v573_v54 = vsel %vm572_vm5, %v569_v53, %v571_v52  ;;  %v575_v55 = vsel %vm572_vm5, %v563_v50, %v569_v53  ;;  %v730_v52 = vld [vmem:[#allocation3] sm:$0xf]  ;;  %vm1187_vm5 = vcmask 916480  }
  0xf9   : > { %v578_v56 = vrot.slane %v573_v54, 4  ;;  %v577_v57 = vrot.slane %v575_v55, 4  ;;  %v796_v55 = vld [vmem:[#allocation3 + $0x4] sm:$0xf] }
  0xfb   : > { %582 = vst [vmem:[#allocation2 + $0x68] sm:$0xf0] %v578_v56 }
  0xfc   : > { %581 = vst [vmem:[#allocation2 + $0x50] sm:$0xf0] %v577_v57  ;;  %v855_v57 = vld [vmem:[#allocation3 + $0x8] sm:$0xf] }
  0xfd   : > { %468 = vrot.lane.b32.xlu1 %v2051_v10, %s1913_s16  ;;  %s286_s16 = sand.u32 1, %s1888_s25  }
  0xfe   : > { %s1642_s17 = sshll.u32 %s286_s16, 3 }
  0xff   : > { %v617_v63 = vpop.permute.xlu2 %616 }
 0x102   : > { %v2169_v53 = vld [vmem:[#allocation2 + $0x68] sm:$0xff] }
 0x103   : > { %v2138_v43 = vld [vmem:[#allocation2 + $0x50] sm:$0xff] }
 0x107   : > { %v596_v9 = vpop.permute.xlu0 %595 }
 0x108   : > { %v598_v16 = vsel %vm597_vm6, %v594_v58, %v596_v9  ;;  %v1032_v58 = vld [vmem:[#allocation3 + $0x14] sm:$0xf] }
 0x109   : > { %v607_v59 = vrot.slane %v598_v16, 4  ;;  %v973_v16 = vld [vmem:[#allocation3 + $0x10] sm:$0xf] }
 0x10b   : > { %611 = vst [vmem:[#allocation2 + $0x8] sm:$0xf0] %v607_v59  ;;  %v1090_v59 = vld [vmem:[#allocation3 + $0x18] sm:$0xf] }
 0x10f   : > { %v603_v60 = vpop.permute.xlu1 %602  ;;  %v636_v4 = vpop.permute.xlu2 %635 }
 0x110   : > { %v605_v8 = vsel %vm597_vm6, %v596_v9, %v603_v60  ;;  %v914_v9 = vld [vmem:[#allocation3 + $0xc] sm:$0xf]  ;;  %v1137_v60 = vld [vmem:[#allocation3 + $0x1c] sm:$0xf] }
 0x111   : > { %v608_v61 = vrot.slane %v605_v8, 4  ;;  %v1196_v8 = vld [vmem:[#allocation3 + $0x20] sm:$0xf] }
 0x112   : > { %v2134_v40 = vld [vmem:[#allocation2 + $0x8] sm:$0xff] }
 0x113   : > { %612 = vst [vmem:[#allocation2 + $0x48] sm:$0xf0] %v608_v61  ;;  %v1254_v61 = vld [vmem:[#allocation3 + $0x24] sm:$0xf] }
 0x117   : > { %v619_v62 = vpop.permute.xlu0 %618 }
 0x118   : > { %v621_v0 = vsel %vm620_vm7, %v617_v63, %v619_v62  ;;  %v1312_v63 = vld [vmem:[#allocation3 + $0x28] sm:$0xf] }
 0x119   : > { %630 = vst [vmem:[#allocation2 + $0x40] sm:$0xf] %v621_v0  ;;  %v1428_v0 = vld [vmem:[#allocation3 + $0x30] sm:$0xf] }
 0x11a   : > { %v2162_v14 = vld [vmem:[#allocation2 + $0x48] sm:$0xff] }
 0x11f   : > { %v627_v2 = vpop.permute.xlu1 %626  ;;  %v659_v17 = vpop.permute.xlu2 %658 }
 0x120   : > { %v629_v3 = vsel %vm620_vm7, %v619_v62, %v627_v2  ;;  %v1370_v62 = vld [vmem:[#allocation3 + $0x2c] sm:$0xf] }
 0x121   : > { %631 = vst [vmem:[#allocation2 + $0x20] sm:$0xf] %v629_v3 }
 0x127   : > { %v638_v10 = vpop.permute.xlu0 %637 }
 0x128   : > { %v640_v5 = vsel %vm639_vm8, %v636_v4, %v638_v10 }
 0x129   : > { %v649_v6 = vrot.slane %v640_v5, 4 }
 0x12b   : > { %653 = vst [vmem:[#allocation2 + $0x40] sm:$0xf0] %v649_v6 }
 0x12f   : > { %v645_v7 = vpop.permute.xlu1 %644 }
 0x130   : > { %v647_v11 = vsel %vm639_vm8, %v638_v10, %v645_v7 }
 0x131   : > { %v650_v12 = vrot.slane %v647_v11, 4 }
 0x132   : > { %v2130_v38 = vld [vmem:[#allocation2 + $0x40] sm:$0xff] }
 0x133   : > { %654 = vst [vmem:[#allocation2 + $0x20] sm:$0xf0] %v650_v12 }
 0x137   : > { %v661_v13 = vpop.permute.xlu0 %660  ;;  %v687_v22 = vpop.permute.xlu2 %686 }
 0x138   : > { %v663_v18 = vsel %vm662_vm9, %v659_v17, %v661_v13 }
 0x139   : > { %672 = vst [vmem:[#allocation2 + $0x10] sm:$0xf] %v663_v18 }
 0x13a   : > { %v2158_v48 = vld [vmem:[#allocation2 + $0x20] sm:$0xff] }
 0x13f   : > { %v669_v19 = vpop.permute.xlu1 %668  ;;  %v701_v29 = vpop.permute.xlu2 %700 }
 0x140   : > { %v671_v20 = vsel %vm662_vm9, %v661_v13, %v669_v19 }
 0x141   : > { %673 = vst [vmem:[#allocation2 + $0x38] sm:$0xf] %v671_v20 }
 0x147   : > { %v678_v21 = vpop.permute.xlu1 %677 }
 0x148   : > { %v503_v31 = vpop.permute.xlu2 %502 }
 0x14f   : > { %v680_v23 = vpop.permute.xlu1 %679 }
 0x150   : > { %v682_v25 = vsel %vm681_vm10, %v678_v21, %v680_v23  ;;  %v689_v26 = vsel %vm681_vm10, %v680_v23, %v687_v22  ;;  %v461_v39 = vpop.permute.xlu2 %460 }
 0x151   : > { %v691_v27 = vrot.slane %v682_v25, 4  ;;  %v692_v28 = vrot.slane %v689_v26, 4 }
 0x153   : > { %695 = vst [vmem:[#allocation2 + $0x10] sm:$0xf0] %v691_v27 }
 0x154   : > { %696 = vst [vmem:[#allocation2 + $0x38] sm:$0xf0] %v692_v28 }
 0x157   : > { %v703_v1 = vpop.permute.xlu0 %702 }
 0x158   : > { %v705_v30 = vsel %vm704_vm12, %v701_v29, %v703_v1 }
 0x159   : > { %714 = vst [vmem:[#allocation2 + $0x60] sm:$0xf] %v705_v30 }
 0x15a   : > { %v2126_v37 = vld [vmem:[#allocation2 + $0x10] sm:$0xff] }
 0x15b   : > { %v2152_v47 = vld [vmem:[#allocation2 + $0x38] sm:$0xff] }
 0x15f   : > { %v509_v32 = vpop.permute.xlu0 %508  ;;  %v711_v33 = vpop.permute.xlu1 %710 }
 0x160   : > { %v2119_v34 = vld [vmem:[#allocation2 + $0x60] sm:$0xf]  ;;  %v515_v35 = vsel %vm313_vm1, %v503_v31, %v509_v32  ;;  %v713_v36 = vsel %vm704_vm12, %v703_v1, %v711_v33 }
 0x161   : > { %516 = vst [vmem:[#allocation2 + $0x58] sm:$0xf] %v515_v35  ;;  %1653 = vmatpush.msk.msrb.mxu0 %vm320_vm0, %v2119_v34  ;;  %1657 = vmatpush.msk.msrb.mxu2 %vm320_vm0, %v2119_v34  ;;  %v1485_v35 = vld [vmem:[%s2508_s2] sm:$0xf] }
 0x162   : > { %715 = vst [vmem:[#allocation2 + $0x28] sm:$0xf] %v713_v36 }
 0x163   : > { %751 = vmatpush.msrb.mxu0 %v2126_v37  ;;  %810 = vmatpush.msrb.mxu2 %v2126_v37 }
 0x165   : > { %752 = vmatpush.msrb.mxu0 %v2130_v38  ;;  %811 = vmatpush.msrb.mxu2 %v2130_v38 }
 0x167   : > { %v467_v41 = vpop.permute.xlu0 %466  ;;  %v511_v42 = vpop.permute.xlu1 %510  ;;  %753 = vmatpush.msrb.mxu0 %v2134_v40  ;;  %812 = vmatpush.msrb.mxu2 %v2134_v40 }
 0x168   : > { %v474_v44 = vsel %vm470_vm13, %v461_v39, %v467_v41  ;;  %v512_v15 = vsel %vm313_vm1, %v509_v32, %v511_v42  ;;  %v2146_v46 = vld [vmem:[#allocation2 + $0x58] sm:$0xff]  ;;  %v2389_v10 = vpop.f32.mrf.mxu3  ;;  %vm788_vm1 = vcmask 785408  }
 0x169   : > { %v2142_v45 = vld [vmem:[#allocation2 + $0x28] sm:$0xf]  ;;  %475 = vst [vmem:[#allocation2 + $0x30] sm:$0xf] %v474_v44  ;;  %754 = vmatpush.msrb.mxu0 %v2138_v43  ;;  %813 = vmatpush.msrb.mxu2 %v2138_v43 }
 0x16a   : > { %517 = vst [vmem:[#allocation2 + $0x18] sm:$0xf] %v512_v15  ;;  %1655 = vmatpush.msk.msrb.mxu1 %vm320_vm0, %v2142_v45  ;;  %1659 = vmatpush.msk.msrb.mxu3 %vm320_vm0, %v2142_v45 }
 0x16b   : > { %755 = vmatpush.msrb.mxu0 %v2146_v46  ;;  %814 = vmatpush.msrb.mxu2 %v2146_v46 }
 0x16c   : > { %771 = vmatpush.msrb.mxu1 %v2152_v47  ;;  %830 = vmatpush.msrb.mxu3 %v2152_v47 }
 0x16e   : > { %772 = vmatpush.msrb.mxu1 %v2158_v48  ;;  %831 = vmatpush.msrb.mxu3 %v2158_v48 }
 0x16f   : > { %v469_v49 = vpop.permute.xlu1 %468 }
 0x170   : > { %v2164_v51 = vld [vmem:[#allocation2 + $0x30] sm:$0xff]  ;;  %773 = vmatpush.msrb.mxu1 %v2162_v14  ;;  %832 = vmatpush.msrb.mxu3 %v2162_v14  ;;  %v471_v50 = vsel %vm470_vm13, %v467_v41, %v469_v49 }
 0x171   : > { %476 = vst [vmem:[#allocation2] sm:$0xf] %v471_v50  ;;  %756 = vmatpush.msrb.mxu0 %v2164_v51  ;;  %815 = vmatpush.msrb.mxu2 %v2164_v51  ;;  %v2175_v54 = vld [vmem:[#allocation2 + $0x18] sm:$0xff] }
 0x172   : > { %774 = vmatpush.msrb.mxu1 %v2169_v53  ;;  %833 = vmatpush.msrb.mxu3 %v2169_v53 }
 0x173   : > { %1654 = vmatmul.msk.f32.vlgmr.msrb.gmra.mxu0 %vm731_vm14, %v730_v52  ;;  %1665 = vmatpush.msk.msra.mxu2 %vm320_vm0, %v2119_v34 }
 0x174   : > { %1661 = vmatpush.msk.msra.mxu0 %vm320_vm0, %v2119_v34  ;;  %775 = vmatpush.msrb.mxu1 %v2175_v54 }
 0x175   : > { %834 = vmatpush.msrb.mxu3 %v2175_v54  ;;  %928 = vmatpush.msra.mxu2 %v2126_v37 }
 0x176   : > { %869 = vmatpush.msra.mxu0 %v2126_v37  ;;  %1658 = vmatmul.msk.f32.vlgmr.msrb.gmra.mxu2 %vm731_vm14, %v796_v55  ;;  %v2385_v2 = vpop.f32.mrf.mxu2 }
 0x177   : > { %929 = vmatpush.msra.mxu2 %v2130_v38 }
 0x178   : > { %v2188_v56 = vld [vmem:[#allocation2] sm:$0xff]  ;;  %870 = vmatpush.msra.mxu0 %v2130_v38 }
 0x179   : > { %930 = vmatpush.msra.mxu2 %v2134_v40  ;;  %776 = vmatpush.msrb.mxu1 %v2188_v56 }
 0x17a   : > { %871 = vmatpush.msra.mxu0 %v2134_v40  ;;  %835 = vmatpush.msrb.mxu3 %v2188_v56 }
 0x17b   : > { %1663 = vmatpush.msk.msra.mxu1 %vm320_vm0, %v2142_v45  ;;  %931 = vmatpush.msra.mxu2 %v2138_v43 }
 0x17c   : > { %872 = vmatpush.msra.mxu0 %v2138_v43  ;;  %1667 = vmatpush.msk.msra.mxu3 %vm320_vm0, %v2142_v45 }
 0x17d   : > { %889 = vmatpush.msra.mxu1 %v2152_v47  ;;  %932 = vmatpush.msra.mxu2 %v2146_v46 }
 0x17e   : > { %873 = vmatpush.msra.mxu0 %v2146_v46  ;;  %948 = vmatpush.msra.mxu3 %v2152_v47 }
 0x17f   : > { %890 = vmatpush.msra.mxu1 %v2158_v48  ;;  %933 = vmatpush.msra.mxu2 %v2164_v51 }
 0x180   : > { %874 = vmatpush.msra.mxu0 %v2164_v51  ;;  %949 = vmatpush.msra.mxu3 %v2158_v48 }
 0x181   : > { %1662 = vmatmul.msk.f32.vlgmr.msra.gmra.mxu0 %vm731_vm14, %v855_v57  ;;  %1666 = vmatmul.msk.f32.vlgmr.msra.gmra.mxu2 %vm731_vm14, %v914_v9 }
 0x182   : > { %1669 = vmatpush.msk.msrb.mxu0 %vm320_vm0, %v2119_v34  ;;  %1673 = vmatpush.msk.msrb.mxu2 %vm320_vm0, %v2119_v34 }
 0x183   : > { %891 = vmatpush.msra.mxu1 %v2162_v14  ;;  %950 = vmatpush.msra.mxu3 %v2162_v14 }
 0x184   : > { %1660 = vmatmul.msk.f32.vlgmr.msrb.gmra.mxu3 %vm731_vm14, %v796_v55  ;;  %987 = vmatpush.msrb.mxu0 %v2126_v37 }
 0x185   : > { %1046 = vmatpush.msrb.mxu2 %v2126_v37  ;;  %892 = vmatpush.msra.mxu1 %v2169_v53 }
 0x186   : > { %951 = vmatpush.msra.mxu3 %v2169_v53  ;;  %988 = vmatpush.msrb.mxu0 %v2130_v38 }
 0x187   : > { %1047 = vmatpush.msrb.mxu2 %v2130_v38  ;;  %893 = vmatpush.msra.mxu1 %v2175_v54 }
 0x188   : > { %952 = vmatpush.msra.mxu3 %v2175_v54  ;;  %1656 = vmatmul.msk.f32.vlgmr.msrb.gmra.mxu1 %vm731_vm14, %v730_v52 }
 0x189   : > { %989 = vmatpush.msrb.mxu0 %v2134_v40  ;;  %1048 = vmatpush.msrb.mxu2 %v2134_v40 }
 0x18a   : > { %894 = vmatpush.msra.mxu1 %v2188_v56  ;;  %953 = vmatpush.msra.mxu3 %v2188_v56 }
 0x18b   : > { %990 = vmatpush.msrb.mxu0 %v2138_v43  ;;  %1049 = vmatpush.msrb.mxu2 %v2138_v43 }
 0x18c   : > { %1671 = vmatpush.msk.msrb.mxu1 %vm320_vm0, %v2142_v45  ;;  %1675 = vmatpush.msk.msrb.mxu3 %vm320_vm0, %v2142_v45 }
 0x18d   : > { %991 = vmatpush.msrb.mxu0 %v2146_v46  ;;  %1050 = vmatpush.msrb.mxu2 %v2146_v46 }
 0x18e   : > { %1007 = vmatpush.msrb.mxu1 %v2152_v47  ;;  %1066 = vmatpush.msrb.mxu3 %v2152_v47 }
 0x18f   : > { %992 = vmatpush.msrb.mxu0 %v2164_v51  ;;  %1051 = vmatpush.msrb.mxu2 %v2164_v51 }
 0x190   : > { %1008 = vmatpush.msrb.mxu1 %v2158_v48  ;;  %1067 = vmatpush.msrb.mxu3 %v2158_v48 }
 0x191   : > { %1674 = vmatmul.msk.f32.vlgmr.msrb.gmra.mxu2 %vm731_vm14, %v1032_v58  ;;  %1677 = vmatpush.msk.msra.mxu0 %vm320_vm0, %v2119_v34 }
 0x192   : > { %1681 = vmatpush.msk.msra.mxu2 %vm320_vm0, %v2119_v34  ;;  %1664 = vmatmul.msk.f32.vlgmr.msra.gmra.mxu1 %vm731_vm14, %v855_v57 }
 0x193   : > { %1009 = vmatpush.msrb.mxu1 %v2162_v14  ;;  %1068 = vmatpush.msrb.mxu3 %v2162_v14 }
 0x194   : > { %1668 = vmatmul.msk.f32.vlgmr.msra.gmra.mxu3 %vm731_vm14, %v914_v9  ;;  %1104 = vmatpush.msra.mxu0 %v2126_v37 }
 0x195   : > { %1151 = vmatpush.msra.mxu2 %v2126_v37  ;;  %1010 = vmatpush.msrb.mxu1 %v2169_v53 }
 0x196   : > { %1069 = vmatpush.msrb.mxu3 %v2169_v53  ;;  %1105 = vmatpush.msra.mxu0 %v2130_v38 }
 0x197   : > { %1152 = vmatpush.msra.mxu2 %v2130_v38  ;;  %1011 = vmatpush.msrb.mxu1 %v2175_v54 }
 0x198   : > { %1070 = vmatpush.msrb.mxu3 %v2175_v54  ;;  %1106 = vmatpush.msra.mxu0 %v2134_v40 }
 0x199   : > { %1153 = vmatpush.msra.mxu2 %v2134_v40  ;;  %1012 = vmatpush.msrb.mxu1 %v2188_v56 }
 0x19a   : > { %1071 = vmatpush.msrb.mxu3 %v2188_v56  ;;  %1107 = vmatpush.msra.mxu0 %v2138_v43 }
 0x19b   : > { %1679 = vmatpush.msk.msra.mxu1 %vm320_vm0, %v2142_v45  ;;  %1154 = vmatpush.msra.mxu2 %v2138_v43 }
 0x19c   : > { %1683 = vmatpush.msk.msra.mxu3 %vm320_vm0, %v2142_v45  ;;  %1670 = vmatmul.msk.f32.vlgmr.msrb.gmra.mxu0 %vm731_vm14, %v973_v16 }
 0x19d   : > { %1676 = vmatmul.msk.f32.vlgmr.msrb.gmra.mxu3 %vm731_vm14, %v1032_v58  ;;  %1108 = vmatpush.msra.mxu0 %v2146_v46 }
 0x19e   : > { %1124 = vmatpush.msra.mxu1 %v2152_v47  ;;  %1155 = vmatpush.msra.mxu2 %v2146_v46 }
 0x19f   : > { %1171 = vmatpush.msra.mxu3 %v2152_v47  ;;  %1109 = vmatpush.msra.mxu0 %v2164_v51 }
 0x1a0   : > { %1125 = vmatpush.msra.mxu1 %v2158_v48  ;;  %1156 = vmatpush.msra.mxu2 %v2164_v51 }
 0x1a1   : > { %1172 = vmatpush.msra.mxu3 %v2158_v48  ;;  %1685 = vmatpush.msk.msrb.mxu0 %vm320_vm0, %v2119_v34 }
 0x1a2   : > { %1689 = vmatpush.msk.msrb.mxu2 %vm320_vm0, %v2119_v34  ;;  %1672 = vmatmul.msk.f32.vlgmr.msrb.gmra.mxu1 %vm731_vm14, %v973_v16 }
 0x1a3   : > { %1126 = vmatpush.msra.mxu1 %v2162_v14  ;;  %1173 = vmatpush.msra.mxu3 %v2162_v14 }
 0x1a4   : > { %1210 = vmatpush.msrb.mxu0 %v2126_v37  ;;  %1268 = vmatpush.msrb.mxu2 %v2126_v37 }
 0x1a5   : > { %1127 = vmatpush.msra.mxu1 %v2169_v53  ;;  %1174 = vmatpush.msra.mxu3 %v2169_v53 }
 0x1a6   : > { %1211 = vmatpush.msrb.mxu0 %v2130_v38  ;;  %1269 = vmatpush.msrb.mxu2 %v2130_v38 }
 0x1a7   : > { %1678 = vmatmul.msk.f32.vlgmr.msra.gmra.mxu0 %vm731_vm14, %v1090_v59  ;;  %1128 = vmatpush.msra.mxu1 %v2175_v54 }
 0x1a8   : > { %1175 = vmatpush.msra.mxu3 %v2175_v54  ;;  %1212 = vmatpush.msrb.mxu0 %v2134_v40 }
 0x1a9   : > { %1270 = vmatpush.msrb.mxu2 %v2134_v40  ;;  %1129 = vmatpush.msra.mxu1 %v2188_v56 }
 0x1aa   : > { %1176 = vmatpush.msra.mxu3 %v2188_v56  ;;  %1213 = vmatpush.msrb.mxu0 %v2138_v43 }
 0x1ab   : > { %1684 = vmatmul.msk.f32.vlgmr.msra.gmra.mxu3 %vm731_vm14, %v1137_v60  ;;  %1687 = vmatpush.msk.msrb.mxu1 %vm320_vm0, %v2142_v45 }
 0x1ac   : > { %1271 = vmatpush.msrb.mxu2 %v2138_v43  ;;  %1691 = vmatpush.msk.msrb.mxu3 %vm320_vm0, %v2142_v45 }
 0x1ad   : > { %1214 = vmatpush.msrb.mxu0 %v2146_v46  ;;  %1230 = vmatpush.msrb.mxu1 %v2152_v47 }
 0x1ae   : > { %1272 = vmatpush.msrb.mxu2 %v2146_v46  ;;  %1288 = vmatpush.msrb.mxu3 %v2152_v47 }
 0x1af   : > { %1682 = vmatmul.msk.f32.vlgmr.msra.gmra.mxu2 %vm731_vm14, %v1137_v60  ;;  %1215 = vmatpush.msrb.mxu0 %v2164_v51 }
 0x1b0   : > { %1231 = vmatpush.msrb.mxu1 %v2158_v48  ;;  %1273 = vmatpush.msrb.mxu2 %v2164_v51 }
 0x1b1   : > { %1289 = vmatpush.msrb.mxu3 %v2158_v48  ;;  %1686 = vmatmul.msk.f32.vlgmr.msrb.gmra.mxu0 %vm731_vm14, %v1196_v8 }
 0x1b2   : > { %1693 = vmatpush.msk.msra.mxu0 %vm320_vm0, %v2119_v34  ;;  %1697 = vmatpush.msk.msra.mxu2 %vm320_vm0, %v2119_v34 }
 0x1b3   : > { %1232 = vmatpush.msrb.mxu1 %v2162_v14  ;;  %1290 = vmatpush.msrb.mxu3 %v2162_v14 }
 0x1b4   : > { %1326 = vmatpush.msra.mxu0 %v2126_v37  ;;  %1384 = vmatpush.msra.mxu2 %v2126_v37 }
 0x1b5   : > { %1233 = vmatpush.msrb.mxu1 %v2169_v53  ;;  %1291 = vmatpush.msrb.mxu3 %v2169_v53 }
 0x1b6   : > { %1327 = vmatpush.msra.mxu0 %v2130_v38  ;;  %1385 = vmatpush.msra.mxu2 %v2130_v38 }
 0x1b7   : > { %1680 = vmatmul.msk.f32.vlgmr.msra.gmra.mxu1 %vm731_vm14, %v1090_v59  ;;  %1292 = vmatpush.msrb.mxu3 %v2175_v54 }
 0x1b8   : > { %1234 = vmatpush.msrb.mxu1 %v2175_v54  ;;  %1328 = vmatpush.msra.mxu0 %v2134_v40 }
 0x1b9   : > { %1386 = vmatpush.msra.mxu2 %v2134_v40  ;;  %1293 = vmatpush.msrb.mxu3 %v2188_v56 }
 0x1ba   : > { %1235 = vmatpush.msrb.mxu1 %v2188_v56  ;;  %1690 = vmatmul.msk.f32.vlgmr.msrb.gmra.mxu2 %vm731_vm14, %v1254_v61 }
 0x1bb   : > { %1692 = vmatmul.msk.f32.vlgmr.msrb.gmra.mxu3 %vm731_vm14, %v1254_v61  ;;  %1329 = vmatpush.msra.mxu0 %v2138_v43 }
 0x1bc   : > { %1695 = vmatpush.msk.msra.mxu1 %vm320_vm0, %v2142_v45  ;;  %1387 = vmatpush.msra.mxu2 %v2138_v43 }
 0x1bd   : > { %1699 = vmatpush.msk.msra.mxu3 %vm320_vm0, %v2142_v45  ;;  %1330 = vmatpush.msra.mxu0 %v2146_v46 }
 0x1be   : > { %1346 = vmatpush.msra.mxu1 %v2152_v47  ;;  %1388 = vmatpush.msra.mxu2 %v2146_v46 }
 0x1bf   : > { %1404 = vmatpush.msra.mxu3 %v2152_v47  ;;  %1331 = vmatpush.msra.mxu0 %v2164_v51 }
 0x1c0   : > { %1347 = vmatpush.msra.mxu1 %v2158_v48  ;;  %1389 = vmatpush.msra.mxu2 %v2164_v51 }
 0x1c1   : > { %1405 = vmatpush.msra.mxu3 %v2158_v48  ;;  %1688 = vmatmul.msk.f32.vlgmr.msrb.gmra.mxu1 %vm731_vm14, %v1196_v8 }
 0x1c2   : > { %1701 = vmatpush.msk.msrb.mxu0 %vm320_vm0, %v2119_v34  ;;  %1348 = vmatpush.msra.mxu1 %v2162_v14  ;;  %v408_v34 = vld [vmem:[%s2512_s6] sm:$0xf] }
 0x1c3   : > { %1406 = vmatpush.msra.mxu3 %v2162_v14  ;;  %1698 = vmatmul.msk.f32.vlgmr.msra.gmra.mxu2 %vm731_vm14, %v1370_v62 }
 0x1c4   : > { %1442 = vmatpush.msrb.mxu0 %v2126_v37  ;;  %1349 = vmatpush.msra.mxu1 %v2169_v53 }
 0x1c5   : > { %1407 = vmatpush.msra.mxu3 %v2169_v53  ;;  %1694 = vmatmul.msk.f32.vlgmr.msra.gmra.mxu0 %vm731_vm14, %v1312_v63 }
 0x1c6   : > { %1443 = vmatpush.msrb.mxu0 %v2130_v38  ;;  %1350 = vmatpush.msra.mxu1 %v2175_v54 }
 0x1c7   : > { %1408 = vmatpush.msra.mxu3 %v2175_v54 }
 0x1c8   : > { %1444 = vmatpush.msrb.mxu0 %v2134_v40  ;;  %1351 = vmatpush.msra.mxu1 %v2188_v56 }
 0x1c9   : > { %1409 = vmatpush.msra.mxu3 %v2188_v56  ;;  %1696 = vmatmul.msk.f32.vlgmr.msra.gmra.mxu1 %vm731_vm14, %v1312_v63 }
 0x1ca   : > { %1445 = vmatpush.msrb.mxu0 %v2138_v43  ;;  %1703 = vmatpush.msk.msrb.mxu1 %vm320_vm0, %v2142_v45 }
 0x1cb   : > { %1700 = vmatmul.msk.f32.vlgmr.msra.gmra.mxu3 %vm731_vm14, %v1370_v62 }
 0x1cc   : > { %1446 = vmatpush.msrb.mxu0 %v2146_v46  ;;  %1462 = vmatpush.msrb.mxu1 %v2152_v47 }
 0x1ce   : > { %1447 = vmatpush.msrb.mxu0 %v2164_v51  ;;  %1463 = vmatpush.msrb.mxu1 %v2158_v48 }
 0x1cf   : > { %1702 = vmatmul.msk.f32.vlgmr.msrb.gmra.mxu0 %vm731_vm14, %v1428_v0 }
 0x1d0   : > { %1464 = vmatpush.msrb.mxu1 %v2162_v14 }
 0x1d2   : > { %1465 = vmatpush.msrb.mxu1 %v2169_v53 }
 0x1d4   : > { %1466 = vmatpush.msrb.mxu1 %v2175_v54 }
 0x1d6   : > { %1467 = vmatpush.msrb.mxu1 %v2188_v56 }
 0x1d7   : > { %1704 = vmatmul.msk.f32.vlgmr.msrb.gmra.mxu1 %vm731_vm14, %v1428_v0 }
 0x1f0   : > { %v758_v3 = vpop.f32.mrf.mxu0 }
 0x1f1   : > { %786 = vrot.lane.b32.xlu0 %v758_v3, %s1914_s19 }
 0x1f9   : > { %v817_v4 = vpop.f32.mrf.mxu2 }
 0x1fa   : > { %845 = vrot.lane.b32.xlu2 %v817_v4, %s1915_s20 }
 0x1fe   : > { %v876_v5 = vpop.f32.mrf.mxu0 }
 0x1ff   : > { %904 = vrot.lane.b32.xlu1 %v876_v5, %s1916_s21 }
 0x204   : > { %v935_v6 = vpop.f32.mrf.mxu2 }
 0x205   : > { %v778_v7 = vpop.f32.mrf.mxu1  ;;  %963 = vrot.lane.b32.xlu0 %v935_v6, %s1917_s22 }
 0x206   : > { %782 = vrot.lane.b32.xlu2 %v778_v7, %s1914_s19 }
 0x207   : > { %v837_v11 = vpop.f32.mrf.mxu3 }
 0x208   : > { %841 = vrot.lane.b32.xlu1 %v837_v11, %s1915_s20 }
 0x20f   : > { %v896_v12 = vpop.f32.mrf.mxu1 }
 0x210   : > { %900 = vrot.lane.b32.xlu0 %v896_v12, %s1916_s21 }
 0x214   : > { %v1053_v13 = vpop.f32.mrf.mxu2 }
 0x215   : > { %1081 = vrot.lane.b32.xlu1 %v1053_v13, %s1918_s23 }
 0x217   : > { %v955_v17 = vpop.f32.mrf.mxu3 }
 0x219   : > { %v994_v18 = vpop.f32.mrf.mxu0 }
 0x21a   : > { %1022 = vrot.lane.b32.xlu2 %v994_v18, %s1919_s29 }
 0x21f   : > { %v1014_v19 = vpop.f32.mrf.mxu1 }
 0x220   : > { %1018 = vrot.lane.b32.xlu1 %v1014_v19, %s1919_s29  ;;  %v1073_v20 = vpop.f32.mrf.mxu3 }
 0x221   : > { %1077 = vrot.lane.b32.xlu0 %v1073_v20, %s1918_s23  ;;  %s1564_s23 = sshll.u32 %s1560_s28, 4  ;;  %s1565_s23 = int_to_ptr.hbm [resolvable:$true] %s1564_s23 }
 0x222   : > { %959 = vrot.lane.b32.xlu2 %v955_v17, %s1917_s22 }
 0x224   : > { %v2399_v21 = vpop.f32.mrf.mxu0 }
 0x22e   : > { %v1217_v22 = vpop.f32.mrf.mxu0  ;;  %v1178_v23 = vpop.f32.mrf.mxu3 }
 0x22f   : > { %1242 = vrot.lane.b32.xlu1 %v1217_v22, %s1914_s19  ;;  %1185 = vrot.lane.b32.xlu0 %v1178_v23, %s1920_s8 }
 0x232   : > { %v1158_v24 = vpop.f32.mrf.mxu2 }
 0x233   : > { %1183 = vrot.lane.b32.xlu2 %v1158_v24, %s1920_s8  ;;  %s1844_s8 = sshra.s32 %s1565_s23, 4  ;;  %s1845_s8 = int_to_ptr.hbm [resolvable:$true] %s1844_s8 }
 0x234   : > { %v2402_v25 = vpop.f32.mrf.mxu1  ;;  %s1846_s9 = scalar_lea.hbm %s1845_s8, 8  ;;  %p1851_p3 = scmp.lt.s32.totalorder %s1845_s8, %s2513_s7 }
 0x235   : > { %p1847_p0 = scmp.ne.s32.totalorder %s1845_s8, %s1846_s9  ;;  %p1852_p4 = scmp.lt.s32.totalorder %s1850_s15, %s1846_s9 }
 0x237   : > { %p1848_p1 = pnand %p1847_p0, %p1999_p5  ;;  %p1853_p7 = por %p1852_p4, %p1851_p3 }
 0x239   : > { %p1849_p2 = pneg %p1848_p1 }
 0x23b   : > { %p1854_p8 = pnand %p1853_p7, %p1849_p2 }
 0x23d   : > { %v1275_v26 = vpop.f32.mrf.mxu2 }
 0x23e   : > { %v1237_v27 = vpop.f32.mrf.mxu1  ;;  %v1295_v28 = vpop.f32.mrf.mxu3  ;;  %1300 = vrot.lane.b32.xlu0 %v1275_v26, %s1915_s20 }
 0x23f   : > { %1302 = vrot.lane.b32.xlu1 %v1295_v28, %s1915_s20  ;;  %1244 = vrot.lane.b32.xlu2 %v1237_v27, %s1914_s19 }
 0x242   : > { %v1333_v29 = vpop.f32.mrf.mxu0 }
 0x246   : > { %v1353_v1 = vpop.f32.mrf.mxu1  ;;  %v1391_v30 = vpop.f32.mrf.mxu2 }
 0x247   : > { %1360 = vrot.lane.b32.xlu0 %v1353_v1, %s1916_s21  ;;  %1416 = vrot.lane.b32.xlu1 %v1391_v30, %s1917_s22 }
 0x248   : > { %1358 = vrot.lane.b32.xlu2 %v1333_v29, %s1916_s21  ;;  %s288_s21 = scalar_lea.vmem [#allocation6], %s1642_s17 }
 0x24c   : > { %v1449_v31 = vpop.f32.mrf.mxu0 }
 0x24e   : > { %v1411_v32 = vpop.f32.mrf.mxu3 }
 0x24f   : > { %1474 = vrot.lane.b32.xlu0 %v1449_v31, %s1919_s29 }
 0x250   : > { %1418 = vrot.lane.b32.xlu2 %v1411_v32, %s1917_s22  ;;  %s1562_s22 = sshll.u32 %s288_s21, 4  ;;  %s1563_s22 = int_to_ptr.vmem [resolvable:$true] %s1562_s22 }
 0x254   : > { %v1469_v33 = vpop.f32.mrf.mxu1  ;;  %v846_v36 = vpop.permute.xlu2 %845 }
 0x255   : > { %1476 = vrot.lane.b32.xlu1 %v1469_v33, %s1919_s29  ;;  %s1549_s29 = scalar_lea.sflag [#allocation5], %s286_s16 }
 0x257   : > { %411 = vperm.xlu0 %1786, %v408_v34  }
 0x258   : > { %1488 = vperm.xlu2 %1787, %v1485_v35  }
 0x260   : > { %v783_v39 = vpop.permute.xlu2 %782 }
 0x263   : > { %v787_v37 = vpop.permute.xlu0 %786 }
 0x264   : > { %v789_v49 = vsel %vm788_vm1, %v787_v37, %v783_v39  ;;  %v792_v51 = vsel %vm788_vm1, %v783_v39, %v787_v37 }
 0x271   : > { %v905_v38 = vpop.permute.xlu1 %904 }
 0x274   : > { %v1023_v41 = vpop.permute.xlu2 %1022 }
 0x277   : > { %v964_v40 = vpop.permute.xlu0 %963 }
 0x27a   : > { %v842_v42 = vpop.permute.xlu1 %841 }
 0x27b   : > { %v848_v48 = vsel %vm847_vm15, %v846_v36, %v842_v42  ;;  %v851_v14 = vsel %vm847_vm15, %v842_v42, %v846_v36 }
 0x27c   : > { %v960_v15 = vpop.permute.xlu2 %959  ;;  %v852_v53 = vadd.f32 %v851_v14, %v792_v51  ;;  %v853_v54 = vadd.f32 %v848_v48, %v789_v49 }
 0x27d   : > { %v966_v58 = vsel %vm965_vm3, %v964_v40, %v960_v15  ;;  %v969_v16 = vsel %vm965_vm3, %v960_v15, %v964_v40 }
 0x282   : > { %v901_v43 = vpop.permute.xlu0 %900 }
 0x283   : > { %v907_v50 = vsel %vm906_vm2, %v905_v38, %v901_v43  ;;  %v910_v52 = vsel %vm906_vm2, %v901_v43, %v905_v38  ;;  %v1505_v38 = vlaneseq }
 0x284   : > { %v911_v55 = vadd.f32 %v910_v52, %v852_v53  ;;  %v912_v56 = vadd.f32 %v907_v50, %v853_v54 }
 0x286   : > { %v970_v61 = vadd.f32 %v969_v16, %v911_v55  ;;  %v971_v62 = vadd.f32 %v966_v58, %v912_v56 }
 0x287   : > { %v1082_v44 = vpop.permute.xlu1 %1081 }
 0x28d   : > { %v1184_v46 = vpop.permute.xlu2 %1183 }
 0x292   : > { %v1019_v47 = vpop.permute.xlu1 %1018 }
 0x293   : > { %v1078_v45 = vpop.permute.xlu0 %1077  ;;  %v1025_v59 = vsel %vm1024_vm4, %v1023_v41, %v1019_v47  ;;  %v1028_v60 = vsel %vm1024_vm4, %v1019_v47, %v1023_v41  ;;  %v1506_v47 = vand.u32 127, %v1505_v38 }
 0x294   : > { %v1029_v63 = vadd.f32 %v1028_v60, %v970_v61  ;;  %v1030_v0 = vadd.f32 %v1025_v59, %v971_v62  ;;  %v1083_v3 = vsel %vm414_vm11, %v1082_v44, %v1078_v45  ;;  %v1086_v4 = vsel %vm414_vm11, %v1078_v45, %v1082_v44 }
 0x295   : > { %v1507_v50 = vadd.s32 128, %v1506_v47  ;;  %vm1508_vm6 = vcmp.ge.s32.totalorder %v1506_v47, 102  ;;  %vm1510_vm7 = vcmp.lt.s32.totalorder %v1506_v47, 106  ;;  %vm1514_vm8 = vcmp.ge.s32.totalorder %v1506_v47, 118 }
 0x296   : > { %v1087_v6 = vadd.f32 %v1086_v4, %v1029_v63  ;;  %v1088_v7 = vadd.f32 %v1083_v3, %v1030_v0  ;;  %vm1516_vm9 = vcmp.lt.s32.totalorder %v1506_v47, 122  ;;  %vm2443_vm12 = vmand %vm1508_vm6, %vm1510_vm7 }
 0x297   : > { %vm1523_vm10 = vcmp.ge.s32.totalorder %v1507_v50, 134  ;;  %vm1525_vm11 = vcmp.lt.s32.totalorder %v1507_v50, 138  ;;  %vm1531_vm13 = vcmp.ge.s32.totalorder %v1507_v50, 150  ;;  %vm1533_vm14 = vcmp.lt.s32.totalorder %v1507_v50, 154 }
 0x298   : > { %v1134_v18 = vadd.f32 %v2399_v21, %v1087_v6  ;;  %v1135_v19 = vadd.f32 %v2402_v25, %v1088_v7 }
 0x299   : > { %v1245_v8 = vpop.permute.xlu2 %1244 }
 0x2a1   : > { %v1186_v57 = vpop.permute.xlu0 %1185  ;;  %v1243_v9 = vpop.permute.xlu1 %1242 }
 0x2a2   : > { %v1188_v12 = vsel %vm1187_vm5, %v1184_v46, %v1186_v57  ;;  %v1192_v13 = vsel %vm1187_vm5, %v1186_v57, %v1184_v46  ;;  %v1359_v17 = vpop.permute.xlu2 %1358  ;;  %v1246_v24 = vsel %vm788_vm1, %v1243_v9, %v1245_v8  ;;  %v1250_v26 = vsel %vm788_vm1, %v1245_v8, %v1243_v9  ;;  %vm2452_vm1 = vmand %vm1523_vm10, %vm1525_vm11 }
 0x2a3   : > { %v1193_v20 = vadd.f32 %v1188_v12, %v1134_v18  ;;  %v1194_v22 = vadd.f32 %v1192_v13, %v1135_v19 }
 0x2a5   : > { %v1251_v29 = vadd.f32 %v1246_v24, %v1193_v20  ;;  %v1252_v1 = vadd.f32 %v1250_v26, %v1194_v22 }
 0x2aa   : > { %v1419_v32 = vpop.permute.xlu2 %1418 }
 0x2b0   : > { %v1301_v5 = vpop.permute.xlu0 %1300 }
 0x2b1   : > { %v1303_v11 = vpop.permute.xlu1 %1302 }
 0x2b2   : > { %v1304_v27 = vsel %vm847_vm15, %v1301_v5, %v1303_v11  ;;  %v1308_v28 = vsel %vm847_vm15, %v1303_v11, %v1301_v5  ;;  %v1489_v15 = vpop.permute.xlu2 %1488  ;;  %vm2447_vm15 = vmand %vm1514_vm8, %vm1516_vm9 }
 0x2b3   : > { %v1309_v25 = vadd.f32 %v1304_v27, %v1251_v29  ;;  %v1310_v33 = vadd.f32 %v1308_v28, %v1252_v1 }
 0x2b9   : > { %v1361_v23 = vpop.permute.xlu0 %1360  ;;  %v1417_v30 = vpop.permute.xlu1 %1416 }
 0x2ba   : > { %v1362_v31 = vsel %vm906_vm2, %v1359_v17, %v1361_v23  ;;  %v1366_v21 = vsel %vm906_vm2, %v1361_v23, %v1359_v17  ;;  %v1420_v36 = vsel %vm965_vm3, %v1417_v30, %v1419_v32  ;;  %v1424_v37 = vsel %vm965_vm3, %v1419_v32, %v1417_v30  ;;  %vm2456_vm2 = vmand %vm1531_vm13, %vm1533_vm14 }
 0x2bb   : > { %v1367_v34 = vadd.f32 %v1362_v31, %v1309_v25  ;;  %v1368_v35 = vadd.f32 %v1366_v21, %v1310_v33  ;;  %vm1520_vm3 = vmor %vm2443_vm12, %vm2447_vm15 }
 0x2bc   : > { %vm1537_vm5 = vmor %vm2452_vm1, %vm2456_vm2 }
 0x2bd   : > { %v1425_v39 = vadd.f32 %v1420_v36, %v1367_v34  ;;  %v1426_v40 = vadd.f32 %v1424_v37, %v1368_v35 }
 0x2c1   : > { %v1475_v41 = vpop.permute.xlu0 %1474 }
 0x2c7   : > { %v1477_v42 = vpop.permute.xlu1 %1476 }
 0x2c8   : > { %v1478_v43 = vsel %vm1024_vm4, %v1475_v41, %v1477_v42  ;;  %v1482_v44 = vsel %vm1024_vm4, %v1477_v42, %v1475_v41 }
 0x2c9   : > { %v1483_v45 = vadd.f32 %v1478_v43, %v1425_v39  ;;  %v1484_v46 = vadd.f32 %v1482_v44, %v1426_v40  ;;  %v412_v59 = vpop.permute.xlu0 %411 }
 0x2ca   : > { %v456_v61 = vadd.f32 %v2389_v10, %v412_v59  ;;  %v436_v3 = vadd.f32 %v2385_v2, %v412_v59 }
 0x2cb   : > { %v1491_v48 = vadd.f32 %v1489_v15, %v1483_v45  ;;  %v1492_v14 = vadd.f32 %v1489_v15, %v1484_v46 }
 0x2cd   : > { %v1495_v49 = vmin.f32 %v1491_v48, 0.0  ;;  %v1496_v51 = vmin.f32 %v1492_v14, 0.0  ;;  %vm1493_vm4 = vcmp.gt.f32.partialorder %v1491_v48, 0.0  ;;  %vm1494_vm6 = vcmp.gt.f32.partialorder %v1492_v14, 0.0 }
 0x2cf   : > { %v1497_v52 = vmul.f32 1.442695, %v1495_v49  ;;  %v1499_v53 = vmul.f32 1.442695, %v1496_v51 }
 0x2d1   : > { %1796 = vpow2.f32 %v1497_v52 }
 0x2d2   : > { %1798 = vpow2.f32 %v1499_v53 }
 0x2d7   : > { %v1797_v9 = vpop.eup %1796 }
 0x2d8   : > { %v1799_v58 = vpop.eup %1798  ;;  %v1705_v16 = vadd.f32 -1.0, %v1797_v9 }
 0x2d9   : > { %v1706_v60 = vadd.f32 -1.0, %v1799_v58 }
 0x2da   : > { %v1503_v8 = vsel %vm1493_vm4, %v1491_v48, %v1705_v16 }
 0x2db   : > { %v1504_v62 = vsel %vm1494_vm6, %v1492_v14, %v1706_v60  ;;  %v1538_v63 = vsel %vm1520_vm3, %v1503_v8, 0.0 }
 0x2dc   : > { %v1539_v0 = vsel %vm1537_vm5, %v1504_v62, 0.0  ;;  %v1540_v5 = vadd.f32 %v1538_v63, %v436_v3 }
 0x2dd   : > { %v1541_v4 = vadd.f32 %v1539_v0, %v456_v61 }
 0x2df   : > { %v1544_v6 = vrot.slane %v1541_v4, 4 }
 0x2e1   : > { %v1545_v7 = vsel %vm320_vm0, %v1540_v5, %v1544_v6 }
 0x2e2   : > { %1547 = vst [vmem:[%s288_s21] sm:$0xff] %v1545_v7 }
 0x2e3   : > { %1857 = shalt.err (!%p1854_p8)
}
 0x2e4   : > { %1718 = dma.vmem_to_hbm [thread:$0]  (%p1999_p5), %s1563_s22, 128, %s1565_s23, %s1549_s29  }
 0x2e5 PF: > { %p1730_p9 = scmp.ge.s32.totalorder %s1896_s27, 2  ;;  %s1576_s16 = sand.u32 1, %s1884_s24  }
 0x2e6   : > { %s1577_s19 = scalar_lea.sflag [#allocation5], %s1576_s16 }
 0x2e7   : > { %p1725_p10 = pnand %p1730_p9, %p2003_p6 }
 0x2e9   : > { %p1726_p11 = pneg %p1725_p10 }
 0x2eb   : > { %1879 = dma.done.wait (%p1726_p11), %s1577_s19, 128  }
 0x2ec   : > { %1881 = vsyncadd (%p1726_p11), %s1577_s19, 4294967168  ;;  %p18_p12 = scmp.ge.s32.totalorder %s1986_s30, 4   ;;  %s2524_s24 = smov %s1888_s25 }
 0x2ed   : > { %s2525_s25 = smov %s1892_s26  ;;  %s2526_s26 = smov %s1997_s10 }
 0x2ee   : > { %s2527_s27 = smov %s1986_s30  ;;  %20 = sbr.rel (!%p18_p12) target bundleno = 4 (0x4), region = 100 }
 0x2f3   :  { %1583 = vsyncpa [#allocation4], 1 }
 0x2f4   :  { %1585 = vsyncpa [#allocation4 + $0x1], 1 }
 0x2f5   :  { %1586 = vsyncpa [#allocation5], 1 }
 0x2f6   :  { %1588 = vsyncpa [#allocation5 + $0x1], 1 }

</bundles_post_ra>
